<compile_context>
chip_gen: v5e
topology: v5e:2x2
jax: 0.10.0
libtpu: 0.0.40
codegen_flags: <defaults>
</compile_context>

<pallas_src>
import functools

import jax
import jax.numpy as jnp
from jax.experimental import pallas as pl
from jax.experimental.pallas import tpu as pltpu


# ----------------------------- Pallas kernels -----------------------------

def _conv1_bn_relu_pool_kernel(x_ref, w_ref, s_ref, b_ref, o_ref, p_ref, *, hw, inv_hw):
    # x_ref: (R, Cin) f32 rows (R = F*hw, whole frames) ; w_ref: (Cin, Cout) bf16
    # s/b: (1, Cout) f32 folded BN ; o_ref: (R, Cout) bf16 ; p_ref: (F, Cout) f32
    R, _ = x_ref.shape
    Cout = w_ref.shape[1]
    x = x_ref[...].astype(jnp.bfloat16)
    y = jnp.dot(x, w_ref[...], preferred_element_type=jnp.float32)
    y = jnp.maximum(y * s_ref[...] + b_ref[...], 0.0)
    o_ref[...] = y.astype(o_ref.dtype)
    p_ref[...] = jnp.sum(y.reshape(R // hw, hw, Cout), axis=1) * inv_hw


def _tam_gl_kernel(pp_ref, wg1_ref, gs_ref, gb_ref, wg2_ref,
                   wla_ref, ls_ref, lb_ref, wlb_ref,
                   kern_ref, act_ref, *, t, K, l_pad):
    # pp_ref: (1, t + 2*l_pad, c) time-padded pooled (f32); channels live in lanes.
    pp = pp_ref[0]                          # (t + 2*l_pad, c)
    p = pp[l_pad:l_pad + t, :]              # (t, c) unpadded pooled

    # --- G: Linear(t->2t) -> BN -> ReLU -> Linear(2t->K) -> Softmax over K ---
    h = jnp.dot(wg1_ref[...], p, preferred_element_type=jnp.float32)        # (2t, c)
    h = jnp.maximum(h * gs_ref[...] + gb_ref[...], 0.0)
    logits = jnp.dot(wg2_ref[...], h, preferred_element_type=jnp.float32)   # (K, c)
    m = jnp.max(logits, axis=0, keepdims=True)
    e = jnp.exp(logits - m)
    kern_ref[0] = e / jnp.sum(e, axis=0, keepdims=True)                      # (K, c)

    # --- L: Conv1d(c->c//4, K, pad=K//2) -> BN -> ReLU -> Conv1d(c//4->c, 1) -> Sigmoid ---
    acc = jnp.dot(pp[0:t, :], wla_ref[0], preferred_element_type=jnp.float32)   # (t, c4)
    for k in range(1, K):
        acc = acc + jnp.dot(pp[k:k + t, :], wla_ref[k],
                            preferred_element_type=jnp.float32)
    hh = jnp.maximum(acc * ls_ref[...] + lb_ref[...], 0.0)
    y = jnp.dot(hh, wlb_ref[...], preferred_element_type=jnp.float32)           # (t, c)
    act_ref[0] = 1.0 / (1.0 + jnp.exp(-y))


def _tam_conv2_bn_relu_kernel(x_ref, act_ref, kern_ref, w_ref, s_ref, b_ref,
                              o_ref, tam_pad, *, t, K, t_pad, H, W, C, Cout, w_off):
    # x_ref:    (1, t, H, W, C) bf16 (conv1 output, one video)
    # act_ref:  (1, t, C) f32 ; kern_ref: (1, K, C) f32
    # w_ref:    (3, 3, C, Cout) bf16 ; s/b: (1, Cout) f32
    # o_ref:    (1, t, H, W, Cout) bf16
    # tam_pad:  VMEM scratch (t, H+2, Wp, C) bf16 -- TAM output placed at rows 1..H,
    #           cols [w_off, w_off+W) (sublane-aligned interior writes).
    dt = tam_pad.dtype

    # Re-zero only the halo strips that conv2 reads (interior is fully overwritten).
    zr = jnp.zeros((t, 1, W + 2, C), dt)
    tam_pad[:, 0:1, w_off - 1:w_off + W + 1, :] = zr
    tam_pad[:, H + 1:H + 2, w_off - 1:w_off + W + 1, :] = zr
    zc = jnp.zeros((t, H, 1, C), dt)
    tam_pad[:, 1:1 + H, w_off - 1:w_off, :] = zc
    tam_pad[:, 1:1 + H, w_off + W:w_off + W + 1, :] = zc

    # Fold local activation and temporal kernel into per-(frame, tap) channel coeffs.
    coeff = act_ref[0][:, None, :] * kern_ref[0][None, :, :]                  # (t, K, C)

    # TAM: per-channel depthwise temporal conv (temporal zero-pad handled statically).
    for tau in range(t):
        terms = []
        for k in range(K):
            src = tau + k - t_pad
            if 0 <= src < t:
                c_sk = coeff[src, k].reshape(1, 1, C)
                terms.append(x_ref[0, src] * c_sk)                            # (H, W, C) f32
        acc = terms[0]
        for term in terms[1:]:
            acc = acc + term
        tam_pad[tau, 1:1 + H, w_off:w_off + W, :] = acc.astype(dt)

    # conv2: 3x3 stride-1 as 9 shifted matmuls, batched over all t frames.
    acc2 = None
    for kh in range(3):
        for kw in range(3):
            c0 = w_off - 1 + kw
            patch = tam_pad[:, kh:kh + H, c0:c0 + W, :].reshape(t * H * W, C)
            part = jnp.dot(patch, w_ref[kh, kw], preferred_element_type=jnp.float32)
            acc2 = part if acc2 is None else acc2 + part
    y = jnp.maximum(acc2 * s_ref[...] + b_ref[...], 0.0)
    o_ref[0] = y.reshape(t, H, W, Cout).astype(o_ref.dtype)


def _conv3_bn_res_relu_kernel(x_ref, w_ref, s_ref, b_ref, r_ref, o_ref):
    # conv3 (1x1) + bn3 + identity residual + relu.
    y = jnp.dot(x_ref[...], w_ref[...], preferred_element_type=jnp.float32)
    y = y * s_ref[...] + b_ref[...]
    o_ref[...] = jnp.maximum(y + r_ref[...], 0.0)


# ----------------------------- tiling helpers -----------------------------

def _pick_frame_tile(NT, HW, target_rows=2048):
    # F whole frames per grid step; keeps the pooled block (F, Cout) sublane-legal.
    valid = [f for f in range(1, NT + 1)
             if NT % f == 0 and (f == NT or (f % 8 == 0 and (f * HW) % 8 == 0))]
    under = [f for f in valid if f * HW <= target_rows]
    return max(under) if under else min(valid)


def _pick_row_tile(M, target_rows=2048):
    valid = [m for m in range(1, M + 1) if M % m == 0 and (m == M or m % 8 == 0)]
    under = [m for m in valid if m <= target_rows]
    return max(under) if under else min(valid)


# ----------------------------- wrappers -----------------------------

def _conv1_bn_relu_pool(x_rows, w, scale, bias, *, NT, HW):
    Cin = x_rows.shape[1]
    Cout = w.shape[1]
    F = _pick_frame_tile(NT, HW)
    R = F * HW
    kernel = functools.partial(_conv1_bn_relu_pool_kernel, hw=HW, inv_hw=1.0 / HW)
    return pl.pallas_call(
        kernel,
        out_shape=(jax.ShapeDtypeStruct((NT * HW, Cout), jnp.bfloat16),
                   jax.ShapeDtypeStruct((NT, Cout), jnp.float32)),
        grid=(NT // F,),
        in_specs=[pl.BlockSpec((R, Cin), lambda i: (i, 0)),
                  pl.BlockSpec((Cin, Cout), lambda i: (0, 0)),
                  pl.BlockSpec((1, Cout), lambda i: (0, 0)),
                  pl.BlockSpec((1, Cout), lambda i: (0, 0))],
        out_specs=[pl.BlockSpec((R, Cout), lambda i: (i, 0)),
                   pl.BlockSpec((F, Cout), lambda i: (i, 0))],
        compiler_params=pltpu.CompilerParams(dimension_semantics=("parallel",)),
    )(x_rows, w, scale.reshape(1, Cout), bias.reshape(1, Cout))


def _tam_gl(pooled_pad, w_g1, gs, gb, w_g2, w_la, ls, lb, w_lb, *, t, K):
    nb, tpad_len, c = pooled_pad.shape
    two_t = w_g1.shape[0]
    c4 = w_la.shape[2]
    kernel = functools.partial(_tam_gl_kernel, t=t, K=K, l_pad=K // 2)
    return pl.pallas_call(
        kernel,
        out_shape=(jax.ShapeDtypeStruct((nb, K, c), jnp.float32),
                   jax.ShapeDtypeStruct((nb, t, c), jnp.float32)),
        grid=(nb,),
        in_specs=[pl.BlockSpec((1, tpad_len, c), lambda i: (i, 0, 0)),
                  pl.BlockSpec((two_t, t), lambda i: (0, 0)),
                  pl.BlockSpec((two_t, 1), lambda i: (0, 0)),
                  pl.BlockSpec((two_t, 1), lambda i: (0, 0)),
                  pl.BlockSpec((K, two_t), lambda i: (0, 0)),
                  pl.BlockSpec((K, c, c4), lambda i: (0, 0, 0)),
                  pl.BlockSpec((1, c4), lambda i: (0, 0)),
                  pl.BlockSpec((1, c4), lambda i: (0, 0)),
                  pl.BlockSpec((c4, c), lambda i: (0, 0))],
        out_specs=[pl.BlockSpec((1, K, c), lambda i: (i, 0, 0)),
                   pl.BlockSpec((1, t, c), lambda i: (i, 0, 0))],
        compiler_params=pltpu.CompilerParams(dimension_semantics=("parallel",)),
    )(pooled_pad, w_g1, gs.reshape(two_t, 1), gb.reshape(two_t, 1), w_g2,
      w_la, ls.reshape(1, c4), lb.reshape(1, c4), w_lb)


def _tam_conv2_bn_relu(x_b, act, kern, w2, scale, bias, *, K, t_pad):
    nb, t, H, W, C = x_b.shape
    Cout = w2.shape[-1]
    w_off = 8                                # sublane-aligned halo offset in scratch
    wp = w_off + W + 8                       # padded width (>= w_off + W + 1)
    kernel = functools.partial(_tam_conv2_bn_relu_kernel, t=t, K=K, t_pad=t_pad,
                               H=H, W=W, C=C, Cout=Cout, w_off=w_off)
    return pl.pallas_call(
        kernel,
        out_shape=jax.ShapeDtypeStruct((nb, t, H, W, Cout), jnp.bfloat16),
        grid=(nb,),
        in_specs=[pl.BlockSpec((1, t, H, W, C), lambda i: (i, 0, 0, 0, 0)),
                  pl.BlockSpec((1, t, C), lambda i: (i, 0, 0)),
                  pl.BlockSpec((1, K, C), lambda i: (i, 0, 0)),
                  pl.BlockSpec((3, 3, C, Cout), lambda i: (0, 0, 0, 0)),
                  pl.BlockSpec((1, Cout), lambda i: (0, 0)),
                  pl.BlockSpec((1, Cout), lambda i: (0, 0))],
        out_specs=pl.BlockSpec((1, t, H, W, Cout), lambda i: (i, 0, 0, 0, 0)),
        scratch_shapes=[pltpu.VMEM((t, H + 2, wp, C), jnp.bfloat16)],
        compiler_params=pltpu.CompilerParams(dimension_semantics=("parallel",)),
    )(x_b, act, kern, w2, scale.reshape(1, Cout), bias.reshape(1, Cout))


def _conv3_bn_res_relu(x_flat, w, scale, bias, res_flat):
    M, Cin = x_flat.shape
    Cout = w.shape[1]
    tm = _pick_row_tile(M)
    return pl.pallas_call(
        _conv3_bn_res_relu_kernel,
        out_shape=jax.ShapeDtypeStruct((M, Cout), jnp.float32),
        grid=(M // tm,),
        in_specs=[pl.BlockSpec((tm, Cin), lambda i: (i, 0)),
                  pl.BlockSpec((Cin, Cout), lambda i: (0, 0)),
                  pl.BlockSpec((1, Cout), lambda i: (0, 0)),
                  pl.BlockSpec((1, Cout), lambda i: (0, 0)),
                  pl.BlockSpec((tm, Cout), lambda i: (i, 0))],
        out_specs=pl.BlockSpec((tm, Cout), lambda i: (i, 0)),
        compiler_params=pltpu.CompilerParams(dimension_semantics=("parallel",)),
    )(x_flat, w, scale.reshape(1, Cout), bias.reshape(1, Cout), res_flat)


# ----------------------------- parameters -----------------------------

def _fold_bn(d, eps=1e-5):
    scale = d["g"] / jnp.sqrt(d["v"] + eps)
    bias = d["b"] - d["m"] * scale
    return scale.astype(jnp.float32), bias.astype(jnp.float32)


def make_params(key, cin, planes, t, K):
    c4 = max(planes // 4, 1)
    ks = jax.random.split(key, 12)

    def nrm(k, shape, scale=0.1):
        return (scale * jax.random.normal(k, shape)).astype(jnp.float32)

    def bn(k, n):
        a, b, c, d = jax.random.split(k, 4)
        return dict(g=(1.0 + 0.1 * jax.random.normal(a, (n,))).astype(jnp.float32),
                    b=(0.1 * jax.random.normal(b, (n,))).astype(jnp.float32),
                    m=(0.1 * jax.random.normal(c, (n,))).astype(jnp.float32),
                    v=(0.5 + jax.random.uniform(d, (n,))).astype(jnp.float32))

    return {
        "w_c1": nrm(ks[0], (cin, planes)),            # conv1 (1x1)  [ci, co]
        "bn1": bn(ks[1], planes),
        "w_c2": nrm(ks[2], (3, 3, planes, planes)),   # conv2 (3x3)  [kh, kw, ci, co]
        "bn2": bn(ks[3], planes),
        "w_c3": nrm(ks[4], (planes, cin)),            # conv3 (1x1)  [ci, co]
        "bn3": bn(ks[5], cin),
        "w_g1": nrm(ks[6], (2 * t, t)),               # TAM G: Linear(t -> 2t) weight [2t, t]
        "g_bn": bn(ks[7], 2 * t),
        "w_g2": nrm(ks[8], (K, 2 * t)),               # TAM G: Linear(2t -> K) weight [K, 2t]
        "w_la": nrm(ks[9], (K, planes, c4)),          # TAM L: Conv1d(c -> c//4, K) [k, ci, co]
        "l_bn": bn(ks[10], c4),
        "w_lb": nrm(ks[11], (c4, planes)),            # TAM L: Conv1d(c//4 -> c, 1) [ci, co]
    }


# ----------------------------- forward -----------------------------

def temporal_bottleneck_forward(x_nchw, params, n_segment, t_kernel=3, t_pad=1):
    NT, Cin, H, W = x_nchw.shape
    t = n_segment
    nb = NT // t
    planes = params["w_c1"].shape[1]
    HW = H * W

    x_nhwc = jnp.transpose(x_nchw, (0, 2, 3, 1)).astype(jnp.float32)   # (NT, H, W, Cin)
    x_rows = x_nhwc.reshape(NT * HW, Cin)                              # free reshape

    # conv1 (1x1) + bn1 + relu, fused with the TAM spatial average pool
    s1, b1 = _fold_bn(params["bn1"])
    out1_rows, pooled = _conv1_bn_relu_pool(
        x_rows, params["w_c1"].astype(jnp.bfloat16), s1, b1, NT=NT, HW=HW)

    # TAM G + L temporal branches (tiny), one fused call; pooled pad is a few KB
    l_pad = t_kernel // 2
    pooled_pad = jnp.pad(pooled.reshape(nb, t, planes),
                         ((0, 0), (l_pad, l_pad), (0, 0)))
    sg, bg = _fold_bn(params["g_bn"])
    sl, bl = _fold_bn(params["l_bn"])
    kern, act = _tam_gl(pooled_pad, params["w_g1"], sg, bg, params["w_g2"],
                        params["w_la"], sl, bl, params["w_lb"], t=t, K=t_kernel)

    # TAM aggregation + conv2 (3x3) + bn2 + relu, one fused call per video
    s2, b2 = _fold_bn(params["bn2"])
    out2 = _tam_conv2_bn_relu(out1_rows.reshape(nb, t, H, W, planes), act, kern,
                              params["w_c2"].astype(jnp.bfloat16), s2, b2,
                              K=t_kernel, t_pad=t_pad)

    # conv3 (1x1) + bn3 + identity residual (downsample=None) + relu
    s3, b3 = _fold_bn(params["bn3"])
    out3 = _conv3_bn_res_relu(out2.reshape(NT * HW, planes),
                              params["w_c3"].astype(jnp.bfloat16), s3, b3, x_rows)
    return jnp.transpose(out3.reshape(NT, H, W, Cin), (0, 3, 1, 2))   # back to NCHW


# ----------------------------- main -----------------------------

if __name__ == "__main__":
    key = jax.random.PRNGKey(0)
    n_segment, n_batch = 8, 2
    planes, H, W = 8, 8, 8
    cin = planes * 4               # Bottleneck expansion = 4, downsample = None
    NT = n_batch * n_segment

    kx, kp = jax.random.split(key)
    x = jax.random.normal(kx, (NT, cin, H, W), dtype=jnp.float32)
    params = make_params(kp, cin, planes, n_segment, K=3)

    y = temporal_bottleneck_forward(x, params, n_segment)
    y = jax.block_until_ready(y)
    assert y.shape == (NT, cin, H, W) and y.dtype == jnp.float32
    print("KERNEL_OK")
</pallas_src>

<mosaic_0001>
module attributes {stable_mosaic.version = 11 : i64} {
  func.func @_conv1_bn_relu_pool_kernel(%arg0: i32, %arg1: memref<1024x32xf32, #tpu.memory_space<vmem>>, %arg2: memref<32x8xbf16, #tpu.memory_space<vmem>>, %arg3: memref<1x8xf32, #tpu.memory_space<vmem>>, %arg4: memref<1x8xf32, #tpu.memory_space<vmem>>, %arg5: memref<1024x8xbf16, #tpu.memory_space<vmem>>, %arg6: memref<16x8xf32, #tpu.memory_space<vmem>>) attributes {dimension_semantics = [#tpu.dimension_semantics<parallel>], iteration_bounds = array<i64: 1>, scalar_prefetch = 0 : i64, scratch_operands = 0 : i64, tpu.core_type = #tpu.core_type<tc>, window_params = [{transform_indices = @transform_0, window_bounds = array<i64: 1024, 32>}, {pipeline_mode = #tpu.pipeline_mode<synchronous>, transform_indices = @transform_1, window_bounds = array<i64: 32, 8>}, {pipeline_mode = #tpu.pipeline_mode<synchronous>, transform_indices = @transform_2, window_bounds = array<i64: 1, 8>}, {pipeline_mode = #tpu.pipeline_mode<synchronous>, transform_indices = @transform_3, window_bounds = array<i64: 1, 8>}, {transform_indices = @transform_4, window_bounds = array<i64: 1024, 8>}, {transform_indices = @transform_5, window_bounds = array<i64: 16, 8>}]} {
    %c0 = arith.constant 0 : index
    %c0_0 = arith.constant 0 : index
    %0 = vector.load %arg1[%c0, %c0_0] : memref<1024x32xf32, #tpu.memory_space<vmem>>, vector<1024x32xf32>
    %1 = arith.truncf %0 : vector<1024x32xf32> to vector<1024x32xbf16>
    %c0_1 = arith.constant 0 : index
    %c0_2 = arith.constant 0 : index
    %2 = vector.load %arg2[%c0_1, %c0_2] : memref<32x8xbf16, #tpu.memory_space<vmem>>, vector<32x8xbf16>
    %cst = arith.constant dense<0.000000e+00> : vector<1024x8xf32>
    %3 = tpu.matmul %1, %2, %cst {dimension_numbers = #tpu.dot_dimension_numbers<[1], [0], [0], [1], [0, 0, 1, 1], [], []>} : vector<1024x32xbf16>, vector<32x8xbf16>, vector<1024x8xf32> -> vector<1024x8xf32>
    %c0_3 = arith.constant 0 : index
    %c0_4 = arith.constant 0 : index
    %4 = vector.load %arg3[%c0_3, %c0_4] : memref<1x8xf32, #tpu.memory_space<vmem>>, vector<1x8xf32>
    %5 = vector.broadcast %4 : vector<1x8xf32> to vector<1024x8xf32>
    %6 = arith.mulf %3, %5 : vector<1024x8xf32>
    %c0_5 = arith.constant 0 : index
    %c0_6 = arith.constant 0 : index
    %7 = vector.load %arg4[%c0_5, %c0_6] : memref<1x8xf32, #tpu.memory_space<vmem>>, vector<1x8xf32>
    %8 = vector.broadcast %7 : vector<1x8xf32> to vector<1024x8xf32>
    %9 = arith.addf %6, %8 : vector<1024x8xf32>
    %cst_7 = arith.constant 0.000000e+00 : f32
    %10 = vector.broadcast %cst_7 : f32 to vector<1024x8xf32>
    %11 = arith.maximumf %9, %10 : vector<1024x8xf32>
    %12 = arith.truncf %11 : vector<1024x8xf32> to vector<1024x8xbf16>
    %c0_8 = arith.constant 0 : index
    %c0_9 = arith.constant 0 : index
    %13 = vector.load %arg5[%c0_8, %c0_9] : memref<1024x8xbf16, #tpu.memory_space<vmem>>, vector<1024x8xbf16>
    tpu.vector_store %arg5[%c0_8, %c0_9], %12 {strides = array<i32>} : memref<1024x8xbf16, #tpu.memory_space<vmem>>, vector<1024x8xbf16>,
    %14 = vector.shape_cast %11 : vector<1024x8xf32> to vector<16x64x8xf32>
    %cst_10 = arith.constant dense<0.000000e+00> : vector<16x8xf32>
    %15 = vector.multi_reduction <add>, %14, %cst_10 [1] : vector<16x64x8xf32> to vector<16x8xf32>
    %cst_11 = arith.constant 1.562500e-02 : f32
    %16 = vector.broadcast %cst_11 : f32 to vector<16x8xf32>
    %17 = arith.mulf %15, %16 : vector<16x8xf32>
    %c0_12 = arith.constant 0 : index
    %c0_13 = arith.constant 0 : index
    %18 = vector.load %arg6[%c0_12, %c0_13] : memref<16x8xf32, #tpu.memory_space<vmem>>, vector<16x8xf32>
    tpu.vector_store %arg6[%c0_12, %c0_13], %17 {strides = array<i32>} : memref<16x8xf32, #tpu.memory_space<vmem>>, vector<16x8xf32>,
    return
  }
  func.func @transform_0(%arg0: i32) -> (i32, i32) {
    %c0_i32 = arith.constant 0 : i32
    %c0_i32_0 = arith.constant 0 : i32
    return %arg0, %c0_i32 : i32, i32
  }
  func.func @transform_1(%arg0: i32) -> (i32, i32) {
    %c0_i32 = arith.constant 0 : i32
    %c0_i32_0 = arith.constant 0 : i32
    %c0_i32_1 = arith.constant 0 : i32
    return %c0_i32, %c0_i32_0 : i32, i32
  }
  func.func @transform_2(%arg0: i32) -> (i32, i32) {
    %c0_i32 = arith.constant 0 : i32
    %c0_i32_0 = arith.constant 0 : i32
    %c0_i32_1 = arith.constant 0 : i32
    return %c0_i32, %c0_i32_0 : i32, i32
  }
  func.func @transform_3(%arg0: i32) -> (i32, i32) {
    %c0_i32 = arith.constant 0 : i32
    %c0_i32_0 = arith.constant 0 : i32
    %c0_i32_1 = arith.constant 0 : i32
    return %c0_i32, %c0_i32_0 : i32, i32
  }
  func.func @transform_4(%arg0: i32) -> (i32, i32) {
    %c0_i32 = arith.constant 0 : i32
    %c0_i32_0 = arith.constant 0 : i32
    return %arg0, %c0_i32 : i32, i32
  }
  func.func @transform_5(%arg0: i32) -> (i32, i32) {
    %c0_i32 = arith.constant 0 : i32
    %c0_i32_0 = arith.constant 0 : i32
    return %arg0, %c0_i32 : i32, i32
  }
}

</mosaic_0001>

<bundles_post_ra>
// kernel: tpu_custom_call.1
= control target key start
LH: loop header
LB: loop body
LE: loop exit
PB: predicated region body
PF: predicated region fallthrough
CT: control target
= control target key end

     0   :  { %vm228_vm0 = vcmask 261120   ;;  %vm1270_vm1 = vcmask 60416   ;;  %vm1399_vm2 = vcmask 64512   ;;  %vm1768_vm3 = vcmask 1041409   ;;  %s3500_s1 = inlined_call_operand.vmem [shape: bf16[32,8], index: 1, kind: input, shape index: {}]   ;;  %s3501_s0 = inlined_call_operand.vmem [shape: f32[1024,32], index: 0, kind: input, shape index: {}]   ;;  %s3502_s2 = inlined_call_operand.vmem [shape: f32[1,8], index: 2, kind: input, shape index: {}]   ;;  %s3503_s3 = inlined_call_operand.vmem [shape: f32[1,8], index: 3, kind: input, shape index: {}]   ;;  %s3504_s4 = inlined_call_operand.vmem [shape: bf16[1024,8], index: 4, kind: output, shape index: {0}]   ;;  %s3505_s5 = inlined_call_operand.vmem [shape: f32[16,8], index: 5, kind: output, shape index: {1}]  }
   0x1   :  { %v1874_v0 = vld [vmem:[%s3500_s1 + $0x8] sm:$0xff]  ;;  %v1873_v1 = vld [vmem:[%s3500_s1] sm:$0xff]  ;;  %v22_v14 = vld [vmem:[%s3501_s0 + $0x10] sm:$0xff]  ;;  %vm1770_vm4 = vcmask 1042434   ;;  %vm1772_vm5 = vcmask 1043459   ;;  %vm1774_vm6 = vcmask 1044484  }
   0x2   :  { %v20_v2 = vld [vmem:[%s3501_s0] sm:$0xff]  ;;  %v21_v3 = vld [vmem:[%s3501_s0 + $0x8] sm:$0xff]  ;;  %427 = vmatpush.bf16.msra.mxu0 %v1874_v0  ;;  %1875 = vmatpush.bf16.msra.mxu1 %v1874_v0  ;;  %v23_v15 = vld [vmem:[%s3501_s0 + $0x18] sm:$0xff]  ;;  %vm1776_vm7 = vcmask 1045509   ;;  %vm1778_vm8 = vcmask 1046534   ;;  %vm1780_vm9 = vcmask 1047559  }
   0x3   :  { %v52_v4 = vld [vmem:[%s3501_s0 + $0x100] sm:$0xff]  ;;  %v53_v5 = vld [vmem:[%s3501_s0 + $0x108] sm:$0xff]  ;;  %1876 = vmatpush.bf16.msra.mxu2 %v1874_v0  ;;  %1877 = vmatpush.bf16.msra.mxu3 %v1874_v0  ;;  %v148_v10 = vpack.c.bf16 %v21_v3, %v20_v2  ;;  %v54_v16 = vld [vmem:[%s3501_s0 + $0x110] sm:$0xff]  ;;  %v149_v22 = vpack.c.bf16 %v23_v15, %v22_v14 }
   0x4   :  { %v84_v6 = vld [vmem:[%s3501_s0 + $0x200] sm:$0xff]  ;;  %v85_v7 = vld [vmem:[%s3501_s0 + $0x208] sm:$0xff]  ;;  %v164_v11 = vpack.c.bf16 %v53_v5, %v52_v4  ;;  %v55_v17 = vld [vmem:[%s3501_s0 + $0x118] sm:$0xff] }
   0x5   :  { %v116_v8 = vld [vmem:[%s3501_s0 + $0x300] sm:$0xff]  ;;  %v117_v9 = vld [vmem:[%s3501_s0 + $0x308] sm:$0xff]  ;;  %v180_v12 = vpack.c.bf16 %v85_v7, %v84_v6  ;;  %v86_v18 = vld [vmem:[%s3501_s0 + $0x210] sm:$0xff]  ;;  %v165_v23 = vpack.c.bf16 %v55_v17, %v54_v16 }
   0x6   :  { %428 = vmatpush.bf16.msra.mxu0 %v1873_v1  ;;  %1878 = vmatpush.bf16.msra.mxu1 %v1873_v1  ;;  %v196_v13 = vpack.c.bf16 %v117_v9, %v116_v8  ;;  %v87_v19 = vld [vmem:[%s3501_s0 + $0x218] sm:$0xff]  ;;  %v118_v20 = vld [vmem:[%s3501_s0 + $0x310] sm:$0xff]  ;;  %v24_v26 = vld [vmem:[%s3501_s0 + $0x20] sm:$0xff] }
   0x7   :  { %1879 = vmatpush.bf16.msra.mxu2 %v1873_v1  ;;  %1880 = vmatpush.bf16.msra.mxu3 %v1873_v1  ;;  %v119_v21 = vld [vmem:[%s3501_s0 + $0x318] sm:$0xff]  ;;  %v181_v24 = vpack.c.bf16 %v87_v19, %v86_v18  ;;  %v25_v27 = vld [vmem:[%s3501_s0 + $0x28] sm:$0xff]  ;;  %v56_v28 = vld [vmem:[%s3501_s0 + $0x120] sm:$0xff] }
   0x8   :  { %v197_v25 = vpack.c.bf16 %v119_v21, %v118_v20  ;;  %v57_v29 = vld [vmem:[%s3501_s0 + $0x128] sm:$0xff]  ;;  %v88_v30 = vld [vmem:[%s3501_s0 + $0x220] sm:$0xff]  ;;  %v150_v34 = vpack.c.bf16 %v25_v27, %v24_v26  ;;  %v26_v38 = vld [vmem:[%s3501_s0 + $0x30] sm:$0xff] }
   0x9   :  { %1809 = vmatmul.msk.bf16.vlgmr.msra.gmra.mxu0 %vm228_vm0, %v148_v10  ;;  %1825 = vmatmul.msk.bf16.vlgmr.msra.gmra.mxu1 %vm228_vm0, %v164_v11  ;;  %v89_v31 = vld [vmem:[%s3501_s0 + $0x228] sm:$0xff]  ;;  %v120_v32 = vld [vmem:[%s3501_s0 + $0x320] sm:$0xff]  ;;  %v166_v35 = vpack.c.bf16 %v57_v29, %v56_v28  ;;  %v27_v39 = vld [vmem:[%s3501_s0 + $0x38] sm:$0xff] }
   0xa   :  { %1841 = vmatmul.msk.bf16.vlgmr.msra.gmra.mxu2 %vm228_vm0, %v180_v12  ;;  %1857 = vmatmul.msk.bf16.vlgmr.msra.gmra.mxu3 %vm228_vm0, %v196_v13  ;;  %v121_v33 = vld [vmem:[%s3501_s0 + $0x328] sm:$0xff]  ;;  %v182_v36 = vpack.c.bf16 %v89_v31, %v88_v30  ;;  %v58_v40 = vld [vmem:[%s3501_s0 + $0x130] sm:$0xff]  ;;  %v59_v41 = vld [vmem:[%s3501_s0 + $0x138] sm:$0xff]  ;;  %v151_v46 = vpack.c.bf16 %v27_v39, %v26_v38 }
   0xb   :  { %v198_v37 = vpack.c.bf16 %v121_v33, %v120_v32  ;;  %v90_v42 = vld [vmem:[%s3501_s0 + $0x230] sm:$0xff]  ;;  %v91_v43 = vld [vmem:[%s3501_s0 + $0x238] sm:$0xff]  ;;  %v167_v47 = vpack.c.bf16 %v59_v41, %v58_v40  ;;  %v28_v50 = vld [vmem:[%s3501_s0 + $0x40] sm:$0xff] }
   0xc   :  { %v122_v44 = vld [vmem:[%s3501_s0 + $0x330] sm:$0xff]  ;;  %v123_v45 = vld [vmem:[%s3501_s0 + $0x338] sm:$0xff]  ;;  %v183_v48 = vpack.c.bf16 %v91_v43, %v90_v42  ;;  %v29_v51 = vld [vmem:[%s3501_s0 + $0x48] sm:$0xff] }
   0xd   :  { %v199_v49 = vpack.c.bf16 %v123_v45, %v122_v44  ;;  %v60_v52 = vld [vmem:[%s3501_s0 + $0x140] sm:$0xff]  ;;  %v61_v53 = vld [vmem:[%s3501_s0 + $0x148] sm:$0xff]  ;;  %v152_v58 = vpack.c.bf16 %v29_v51, %v28_v50  ;;  %v30_v62 = vld [vmem:[%s3501_s0 + $0x50] sm:$0xff] }
   0xe   :  { %v92_v54 = vld [vmem:[%s3501_s0 + $0x240] sm:$0xff]  ;;  %v93_v55 = vld [vmem:[%s3501_s0 + $0x248] sm:$0xff]  ;;  %v168_v59 = vpack.c.bf16 %v61_v53, %v60_v52  ;;  %v31_v63 = vld [vmem:[%s3501_s0 + $0x58] sm:$0xff] }
   0xf   :  { %v124_v56 = vld [vmem:[%s3501_s0 + $0x340] sm:$0xff]  ;;  %v125_v57 = vld [vmem:[%s3501_s0 + $0x348] sm:$0xff]  ;;  %v184_v60 = vpack.c.bf16 %v93_v55, %v92_v54  ;;  %v62_v0 = vld [vmem:[%s3501_s0 + $0x150] sm:$0xff]  ;;  %v153_v6 = vpack.c.bf16 %v31_v63, %v30_v62 }
  0x10   :  { %v200_v61 = vpack.c.bf16 %v125_v57, %v124_v56  ;;  %v63_v1 = vld [vmem:[%s3501_s0 + $0x158] sm:$0xff]  ;;  %v94_v2 = vld [vmem:[%s3501_s0 + $0x250] sm:$0xff]  ;;  %v32_v10 = vld [vmem:[%s3501_s0 + $0x60] sm:$0xff] }
  0x11   :  { %v95_v3 = vld [vmem:[%s3501_s0 + $0x258] sm:$0xff]  ;;  %v126_v4 = vld [vmem:[%s3501_s0 + $0x350] sm:$0xff]  ;;  %v169_v7 = vpack.c.bf16 %v63_v1, %v62_v0  ;;  %v33_v11 = vld [vmem:[%s3501_s0 + $0x68] sm:$0xff] }
  0x12   :  { %v127_v5 = vld [vmem:[%s3501_s0 + $0x358] sm:$0xff]  ;;  %v185_v8 = vpack.c.bf16 %v95_v3, %v94_v2  ;;  %v64_v12 = vld [vmem:[%s3501_s0 + $0x160] sm:$0xff]  ;;  %v65_v13 = vld [vmem:[%s3501_s0 + $0x168] sm:$0xff]  ;;  %v154_v18 = vpack.c.bf16 %v33_v11, %v32_v10 }
  0x13   :  { %v201_v9 = vpack.c.bf16 %v127_v5, %v126_v4  ;;  %v96_v14 = vld [vmem:[%s3501_s0 + $0x260] sm:$0xff]  ;;  %v97_v15 = vld [vmem:[%s3501_s0 + $0x268] sm:$0xff]  ;;  %v170_v19 = vpack.c.bf16 %v65_v13, %v64_v12  ;;  %v98_v26 = vld [vmem:[%s3501_s0 + $0x270] sm:$0xff] }
  0x14   :  { %v128_v16 = vld [vmem:[%s3501_s0 + $0x360] sm:$0xff]  ;;  %v129_v17 = vld [vmem:[%s3501_s0 + $0x368] sm:$0xff]  ;;  %v186_v20 = vpack.c.bf16 %v97_v15, %v96_v14  ;;  %v99_v27 = vld [vmem:[%s3501_s0 + $0x278] sm:$0xff] }
  0x15   :  { %v202_v21 = vpack.c.bf16 %v129_v17, %v128_v16  ;;  %v130_v28 = vld [vmem:[%s3501_s0 + $0x370] sm:$0xff]  ;;  %v131_v29 = vld [vmem:[%s3501_s0 + $0x378] sm:$0xff]  ;;  %v187_v32 = vpack.c.bf16 %v99_v27, %v98_v26  ;;  %v69_v38 = vld [vmem:[%s3501_s0 + $0x188] sm:$0xff] }
  0x16   :  { %v203_v33 = vpack.c.bf16 %v131_v29, %v130_v28  ;;  %v100_v39 = vld [vmem:[%s3501_s0 + $0x280] sm:$0xff]  ;;  %v101_v40 = vld [vmem:[%s3501_s0 + $0x288] sm:$0xff]  ;;  %v38_v0 = vld [vmem:[%s3501_s0 + $0x90] sm:$0xff] }
  0x17   :  { %v132_v41 = vld [vmem:[%s3501_s0 + $0x380] sm:$0xff]  ;;  %v133_v42 = vld [vmem:[%s3501_s0 + $0x388] sm:$0xff]  ;;  %v39_v3 = vld [vmem:[%s3501_s0 + $0x98] sm:$0xff] }
  0x18   :  { %v2179_v43 = vld [vmem:[%s3503_s3] ss:$0 sm:$0xff]  ;;  %v70_v4 = vld [vmem:[%s3501_s0 + $0x190] sm:$0xff]  ;;  %v71_v5 = vld [vmem:[%s3501_s0 + $0x198] sm:$0xff]  ;;  %v157_v16 = vpack.c.bf16 %v39_v3, %v38_v0 }
  0x19   :  { %1810 = vmatmul.msk.bf16.gmra.mxu0 %vm228_vm0, %v149_v22  ;;  %1826 = vmatmul.msk.bf16.gmra.mxu1 %vm228_vm0, %v165_v23  ;;  %v34_v22 = vld [vmem:[%s3501_s0 + $0x70] sm:$0xff]  ;;  %v35_v23 = vld [vmem:[%s3501_s0 + $0x78] sm:$0xff]  ;;  %v173_v17 = vpack.c.bf16 %v71_v5, %v70_v4 }
  0x1a   :  { %1842 = vmatmul.msk.bf16.gmra.mxu2 %vm228_vm0, %v181_v24  ;;  %1858 = vmatmul.msk.bf16.gmra.mxu3 %vm228_vm0, %v197_v25  ;;  %v66_v24 = vld [vmem:[%s3501_s0 + $0x170] sm:$0xff]  ;;  %v67_v25 = vld [vmem:[%s3501_s0 + $0x178] sm:$0xff]  ;;  %v155_v30 = vpack.c.bf16 %v35_v23, %v34_v22 }
  0x1b   :  { %v171_v31 = vpack.c.bf16 %v67_v25, %v66_v24  ;;  %v134_v12 = vld [vmem:[%s3501_s0 + $0x390] sm:$0xff]  ;;  %v135_v13 = vld [vmem:[%s3501_s0 + $0x398] sm:$0xff] }
  0x1c   :  { %v205_v25 = vpack.c.bf16 %v135_v13, %v134_v12  ;;  %v73_v12 = vld [vmem:[%s3501_s0 + $0x1a8] sm:$0xff]  ;;  %v104_v13 = vld [vmem:[%s3501_s0 + $0x2a0] sm:$0xff] }
  0x29   :  { %1811 = vmatmul.msk.bf16.gmra.mxu0 %vm228_vm0, %v150_v34  ;;  %1827 = vmatmul.msk.bf16.gmra.mxu1 %vm228_vm0, %v166_v35  ;;  %v2150_v34 = vld [vmem:[%s3502_s2] ss:$0 sm:$0xff] }
  0x2a   :  { %1843 = vmatmul.msk.bf16.gmra.mxu2 %vm228_vm0, %v182_v36  ;;  %1859 = vmatmul.msk.bf16.gmra.mxu3 %vm228_vm0, %v198_v37  ;;  %v36_v35 = vld [vmem:[%s3501_s0 + $0x80] sm:$0xff]  ;;  %v37_v36 = vld [vmem:[%s3501_s0 + $0x88] sm:$0xff] }
  0x2b   :  { %v68_v37 = vld [vmem:[%s3501_s0 + $0x180] sm:$0xff]  ;;  %v156_v44 = vpack.c.bf16 %v37_v36, %v36_v35 }
  0x2c   :  { %v172_v45 = vpack.c.bf16 %v69_v38, %v68_v37 }
  0x39   :  { %1812 = vmatmul.msk.bf16.gmra.mxu0 %vm228_vm0, %v151_v46  ;;  %1828 = vmatmul.msk.bf16.gmra.mxu1 %vm228_vm0, %v167_v47 }
  0x3a   :  { %1844 = vmatmul.msk.bf16.gmra.mxu2 %vm228_vm0, %v183_v48  ;;  %1860 = vmatmul.msk.bf16.gmra.mxu3 %vm228_vm0, %v199_v49  ;;  %v188_v48 = vpack.c.bf16 %v101_v40, %v100_v39  ;;  %v204_v49 = vpack.c.bf16 %v133_v42, %v132_v41 }
  0x49   :  { %1813 = vmatmul.msk.bf16.gmra.mxu0 %vm228_vm0, %v152_v58  ;;  %1829 = vmatmul.msk.bf16.gmra.mxu1 %vm228_vm0, %v168_v59 }
  0x4a   :  { %1845 = vmatmul.msk.bf16.gmra.mxu2 %vm228_vm0, %v184_v60  ;;  %1861 = vmatmul.msk.bf16.gmra.mxu3 %vm228_vm0, %v200_v61 }
  0x59   :  { %1814 = vmatmul.msk.bf16.gmra.mxu0 %vm228_vm0, %v153_v6  ;;  %1830 = vmatmul.msk.bf16.gmra.mxu1 %vm228_vm0, %v169_v7 }
  0x5a   :  { %1846 = vmatmul.msk.bf16.gmra.mxu2 %vm228_vm0, %v185_v8  ;;  %1862 = vmatmul.msk.bf16.gmra.mxu3 %vm228_vm0, %v201_v9  ;;  %v102_v8 = vld [vmem:[%s3501_s0 + $0x290] sm:$0xff]  ;;  %v103_v9 = vld [vmem:[%s3501_s0 + $0x298] sm:$0xff] }
  0x69   :  { %1815 = vmatmul.msk.bf16.gmra.mxu0 %vm228_vm0, %v154_v18  ;;  %1831 = vmatmul.msk.bf16.gmra.mxu1 %vm228_vm0, %v170_v19 }
  0x6a   :  { %1847 = vmatmul.msk.bf16.gmra.mxu2 %vm228_vm0, %v186_v20  ;;  %1863 = vmatmul.msk.bf16.gmra.mxu3 %vm228_vm0, %v202_v21  ;;  %v189_v21 = vpack.c.bf16 %v103_v9, %v102_v8  ;;  %v40_v8 = vld [vmem:[%s3501_s0 + $0xa0] sm:$0xff]  ;;  %v41_v9 = vld [vmem:[%s3501_s0 + $0xa8] sm:$0xff] }
  0x79   :  { %1816 = vmatmul.msk.bf16.gmra.mxu0 %vm228_vm0, %v155_v30  ;;  %1832 = vmatmul.msk.bf16.gmra.mxu1 %vm228_vm0, %v171_v31 }
  0x7a   :  { %1848 = vmatmul.msk.bf16.gmra.mxu2 %vm228_vm0, %v187_v32  ;;  %1864 = vmatmul.msk.bf16.gmra.mxu3 %vm228_vm0, %v203_v33 }
  0x86   :  { %v430_v46 = vpop.f32.mrf.mxu0  ;;  %v510_v47 = vpop.f32.mrf.mxu1 }
  0x87   :  { %v754_v50 = vmul.f32 %v2150_v34, %v430_v46  ;;  %v786_v51 = vmul.f32 %v2150_v34, %v510_v47 }
  0x89   :  { %v886_v52 = vadd.f32 %v2179_v43, %v754_v50  ;;  %v918_v53 = vadd.f32 %v2179_v43, %v786_v51  ;;  %1817 = vmatmul.msk.bf16.gmra.mxu0 %vm228_vm0, %v156_v44  ;;  %1833 = vmatmul.msk.bf16.gmra.mxu1 %vm228_vm0, %v172_v45 }
  0x8a   :  { %1849 = vmatmul.msk.bf16.gmra.mxu2 %vm228_vm0, %v188_v48  ;;  %1865 = vmatmul.msk.bf16.gmra.mxu3 %vm228_vm0, %v204_v49 }
  0x8b   :  { %v1014_v54 = vmax.f32 %v886_v52, 0.0  ;;  %v1046_v55 = vmax.f32 %v918_v53, 0.0 }
  0x8d   :  { %v1142_v56 = vpack.c.bf16 %v1014_v54, %v1014_v54  ;;  %v1174_v57 = vpack.c.bf16 %v1046_v55, %v1046_v55  ;;  %v590_v58 = vpop.f32.mrf.mxu2  ;;  %v670_v59 = vpop.f32.mrf.mxu3  ;;  %v1484_v18 = vsel %vm1399_vm2, %v1046_v55, 0.0  ;;  %v1400_v22 = vsel %vm1399_vm2, %v1014_v54, 0.0 }
  0x8e   :  { %v818_v60 = vmul.f32 %v2150_v34, %v590_v58  ;;  %v850_v61 = vmul.f32 %v2150_v34, %v670_v59  ;;  %v432_v62 = vpop.f32.mrf.mxu0  ;;  %v512_v63 = vpop.f32.mrf.mxu1 }
  0x8f   :  { %1271 = vst.msk [vmem:[%s3504_s4] sm:$0xf] %vm1270_vm1, %v1142_v56  ;;  %v755_v1 = vmul.f32 %v2150_v34, %v432_v62  ;;  %v787_v2 = vmul.f32 %v2150_v34, %v512_v63 }
  0x90   :  { %1303 = vst.msk [vmem:[%s3504_s4 + $0x80] sm:$0xf] %vm1270_vm1, %v1174_v57  ;;  %v950_v6 = vadd.f32 %v2179_v43, %v818_v60  ;;  %v982_v7 = vadd.f32 %v2179_v43, %v850_v61 }
  0x91   :  { %v887_v10 = vadd.f32 %v2179_v43, %v755_v1  ;;  %v919_v11 = vadd.f32 %v2179_v43, %v787_v2 }
  0x92   :  { %v1078_v14 = vmax.f32 %v950_v6, 0.0  ;;  %v1110_v15 = vmax.f32 %v982_v7, 0.0 }
  0x93   :  { %v1015_v19 = vmax.f32 %v887_v10, 0.0  ;;  %v1047_v20 = vmax.f32 %v919_v11, 0.0  ;;  %v72_v11 = vld [vmem:[%s3501_s0 + $0x1a0] sm:$0xff] }
  0x94   :  { %v1206_v23 = vpack.c.bf16 %v1078_v14, %v1078_v14  ;;  %v1238_v24 = vpack.c.bf16 %v1110_v15, %v1110_v15  ;;  %v1568_v48 = vsel %vm1399_vm2, %v1078_v14, 0.0  ;;  %v1652_v49 = vsel %vm1399_vm2, %v1110_v15, 0.0 }
  0x95   :  { %v1143_v26 = vpack.c.bf16 %v1015_v19, %v1015_v19  ;;  %v1401_v27 = vsel %vm1399_vm2, %v1015_v19, 0.0  ;;  %v1175_v28 = vpack.c.bf16 %v1047_v20, %v1047_v20  ;;  %v1485_v29 = vsel %vm1399_vm2, %v1047_v20, 0.0  ;;  %v592_v30 = vpop.f32.mrf.mxu2  ;;  %v672_v31 = vpop.f32.mrf.mxu3  ;;  %v137_v19 = vld [vmem:[%s3501_s0 + $0x3a8] sm:$0xff] }
  0x96   :  { %1335 = vst.msk [vmem:[%s3504_s4 + $0x100] sm:$0xf] %vm1270_vm1, %v1206_v23  ;;  %v1402_v32 = vadd.f32 %v1401_v27, %v1400_v22  ;;  %v1486_v33 = vadd.f32 %v1485_v29, %v1484_v18  ;;  %v819_v35 = vmul.f32 %v2150_v34, %v592_v30  ;;  %v851_v36 = vmul.f32 %v2150_v34, %v672_v31  ;;  %v435_v37 = vpop.f32.mrf.mxu0  ;;  %v515_v38 = vpop.f32.mrf.mxu1  ;;  %v136_v18 = vld [vmem:[%s3501_s0 + $0x3a0] sm:$0xff] }
  0x97   :  { %1367 = vst.msk [vmem:[%s3504_s4 + $0x180] sm:$0xf] %vm1270_vm1, %v1238_v24  ;;  %v756_v39 = vmul.f32 %v2150_v34, %v435_v37  ;;  %v788_v40 = vmul.f32 %v2150_v34, %v515_v38  ;;  %v206_v29 = vpack.c.bf16 %v137_v19, %v136_v18  ;;  %v75_v18 = vld [vmem:[%s3501_s0 + $0x1b8] sm:$0xff]  ;;  %v106_v19 = vld [vmem:[%s3501_s0 + $0x2b0] sm:$0xff] }
  0x98   :  { %1272 = vst.msk [vmem:[%s3504_s4 + $0x4] sm:$0xf] %vm1270_vm1, %v1143_v26  ;;  %v951_v41 = vadd.f32 %v2179_v43, %v819_v35  ;;  %v983_v42 = vadd.f32 %v2179_v43, %v851_v36 }
  0x99   :  { %1304 = vst.msk [vmem:[%s3504_s4 + $0x84] sm:$0xf] %vm1270_vm1, %v1175_v28  ;;  %v888_v44 = vadd.f32 %v2179_v43, %v756_v39  ;;  %v920_v45 = vadd.f32 %v2179_v43, %v788_v40  ;;  %1818 = vmatmul.msk.bf16.gmra.mxu0 %vm228_vm0, %v157_v16  ;;  %1834 = vmatmul.msk.bf16.gmra.mxu1 %vm228_vm0, %v173_v17  ;;  %v105_v17 = vld [vmem:[%s3501_s0 + $0x2a8] sm:$0xff] }
  0x9a   :  { %v1079_v46 = vmax.f32 %v951_v41, 0.0  ;;  %v1111_v47 = vmax.f32 %v983_v42, 0.0  ;;  %1850 = vmatmul.msk.bf16.gmra.mxu2 %vm228_vm0, %v189_v21  ;;  %1866 = vmatmul.msk.bf16.gmra.mxu3 %vm228_vm0, %v205_v25  ;;  %v158_v21 = vpack.c.bf16 %v41_v9, %v40_v8  ;;  %v174_v25 = vpack.c.bf16 %v73_v12, %v72_v11 }
  0x9b   :  { %v1016_v50 = vmax.f32 %v888_v44, 0.0  ;;  %v1048_v51 = vmax.f32 %v920_v45, 0.0  ;;  %v190_v28 = vpack.c.bf16 %v105_v17, %v104_v13  ;;  %v74_v17 = vld [vmem:[%s3501_s0 + $0x1b0] sm:$0xff] }
  0x9c   :  { %v1207_v52 = vpack.c.bf16 %v1079_v46, %v1079_v46  ;;  %v1569_v53 = vsel %vm1399_vm2, %v1079_v46, 0.0  ;;  %v1239_v54 = vpack.c.bf16 %v1111_v47, %v1111_v47  ;;  %v1653_v55 = vsel %vm1399_vm2, %v1111_v47, 0.0 }
  0x9d   :  { %v1570_v56 = vadd.f32 %v1569_v53, %v1568_v48  ;;  %v1654_v57 = vadd.f32 %v1653_v55, %v1652_v49  ;;  %v1144_v58 = vpack.c.bf16 %v1016_v50, %v1016_v50  ;;  %v1403_v59 = vsel %vm1399_vm2, %v1016_v50, 0.0  ;;  %v595_v60 = vpop.f32.mrf.mxu2  ;;  %v675_v61 = vpop.f32.mrf.mxu3 }
  0x9e   :  { %1336 = vst.msk [vmem:[%s3504_s4 + $0x104] sm:$0xf] %vm1270_vm1, %v1207_v52  ;;  %v1404_v62 = vadd.f32 %v1403_v59, %v1402_v32  ;;  %v1176_v63 = vpack.c.bf16 %v1048_v51, %v1048_v51  ;;  %v1487_v0 = vsel %vm1399_vm2, %v1048_v51, 0.0  ;;  %v820_v1 = vmul.f32 %v2150_v34, %v595_v60  ;;  %v437_v2 = vpop.f32.mrf.mxu0  ;;  %v517_v3 = vpop.f32.mrf.mxu1 }
  0x9f   :  { %1368 = vst.msk [vmem:[%s3504_s4 + $0x184] sm:$0xf] %vm1270_vm1, %v1239_v54  ;;  %v1488_v4 = vadd.f32 %v1487_v0, %v1486_v33  ;;  %v852_v5 = vmul.f32 %v2150_v34, %v675_v61  ;;  %v757_v6 = vmul.f32 %v2150_v34, %v437_v2  ;;  %v789_v7 = vmul.f32 %v2150_v34, %v517_v3 }
  0xa0   :  { %1273 = vst.msk [vmem:[%s3504_s4 + $0x8] sm:$0xf] %vm1270_vm1, %v1144_v58  ;;  %v952_v10 = vadd.f32 %v2179_v43, %v820_v1 }
  0xa1   :  { %1305 = vst.msk [vmem:[%s3504_s4 + $0x88] sm:$0xf] %vm1270_vm1, %v1176_v63  ;;  %v984_v14 = vadd.f32 %v2179_v43, %v852_v5  ;;  %v889_v15 = vadd.f32 %v2179_v43, %v757_v6  ;;  %v921_v16 = vadd.f32 %v2179_v43, %v789_v7 }
  0xa2   :  { %v1080_v20 = vmax.f32 %v952_v10, 0.0 }
  0xa3   :  { %v1112_v22 = vmax.f32 %v984_v14, 0.0  ;;  %v1017_v23 = vmax.f32 %v889_v15, 0.0  ;;  %v1049_v24 = vmax.f32 %v921_v16, 0.0  ;;  %v42_v14 = vld [vmem:[%s3501_s0 + $0xb0] sm:$0xff]  ;;  %v43_v15 = vld [vmem:[%s3501_s0 + $0xb8] sm:$0xff] }
  0xa4   :  { %v1208_v26 = vpack.c.bf16 %v1080_v20, %v1080_v20  ;;  %v1571_v27 = vsel %vm1399_vm2, %v1080_v20, 0.0 }
  0xa5   :  { %v1572_v30 = vadd.f32 %v1571_v27, %v1570_v56  ;;  %v1240_v31 = vpack.c.bf16 %v1112_v22, %v1112_v22  ;;  %v1655_v32 = vsel %vm1399_vm2, %v1112_v22, 0.0  ;;  %v1145_v33 = vpack.c.bf16 %v1017_v23, %v1017_v23  ;;  %v597_v35 = vpop.f32.mrf.mxu2  ;;  %v677_v36 = vpop.f32.mrf.mxu3 }
  0xa6   :  { %1337 = vst.msk [vmem:[%s3504_s4 + $0x108] sm:$0xf] %vm1270_vm1, %v1208_v26  ;;  %v1656_v37 = vadd.f32 %v1655_v32, %v1654_v57  ;;  %v1405_v38 = vsel %vm1399_vm2, %v1017_v23, 0.0  ;;  %v1177_v39 = vpack.c.bf16 %v1049_v24, %v1049_v24  ;;  %v1489_v40 = vsel %vm1399_vm2, %v1049_v24, 0.0  ;;  %v440_v41 = vpop.f32.mrf.mxu0  ;;  %v520_v42 = vpop.f32.mrf.mxu1  ;;  %v107_v23 = vld [vmem:[%s3501_s0 + $0x2b8] sm:$0xff]  ;;  %v138_v24 = vld [vmem:[%s3501_s0 + $0x3b0] sm:$0xff] }
  0xa7   :  { %1369 = vst.msk [vmem:[%s3504_s4 + $0x188] sm:$0xf] %vm1270_vm1, %v1240_v31  ;;  %v1406_v44 = vadd.f32 %v1405_v38, %v1404_v62  ;;  %v1490_v45 = vadd.f32 %v1489_v40, %v1488_v4  ;;  %v821_v46 = vmul.f32 %v2150_v34, %v597_v35  ;;  %v853_v47 = vmul.f32 %v2150_v34, %v677_v36 }
  0xa8   :  { %1274 = vst.msk [vmem:[%s3504_s4 + $0xc] sm:$0xf] %vm1270_vm1, %v1145_v33  ;;  %v758_v48 = vmul.f32 %v2150_v34, %v440_v41  ;;  %v790_v49 = vmul.f32 %v2150_v34, %v520_v42  ;;  %v159_v27 = vpack.c.bf16 %v43_v15, %v42_v14  ;;  %v175_v31 = vpack.c.bf16 %v75_v18, %v74_v17  ;;  %v45_v17 = vld [vmem:[%s3501_s0 + $0xc8] sm:$0xff]  ;;  %v76_v18 = vld [vmem:[%s3501_s0 + $0x1c0] sm:$0xff] }
  0xa9   :  { %1306 = vst.msk [vmem:[%s3504_s4 + $0x8c] sm:$0xf] %vm1270_vm1, %v1177_v39  ;;  %v953_v50 = vadd.f32 %v2179_v43, %v821_v46  ;;  %v985_v51 = vadd.f32 %v2179_v43, %v853_v47  ;;  %1819 = vmatmul.msk.bf16.gmra.mxu0 %vm228_vm0, %v158_v21  ;;  %1835 = vmatmul.msk.bf16.gmra.mxu1 %vm228_vm0, %v174_v25  ;;  %v139_v25 = vld [vmem:[%s3501_s0 + $0x3b8] sm:$0xff] }
  0xaa   :  { %v890_v52 = vadd.f32 %v2179_v43, %v758_v48  ;;  %v922_v53 = vadd.f32 %v2179_v43, %v790_v49  ;;  %1851 = vmatmul.msk.bf16.gmra.mxu2 %vm228_vm0, %v190_v28  ;;  %1867 = vmatmul.msk.bf16.gmra.mxu3 %vm228_vm0, %v206_v29  ;;  %v207_v38 = vpack.c.bf16 %v139_v25, %v138_v24  ;;  %v108_v24 = vld [vmem:[%s3501_s0 + $0x2c0] sm:$0xff]  ;;  %v109_v25 = vld [vmem:[%s3501_s0 + $0x2c8] sm:$0xff] }
  0xab   :  { %v1081_v54 = vmax.f32 %v953_v50, 0.0  ;;  %v1113_v55 = vmax.f32 %v985_v51, 0.0 }
  0xac   :  { %v1018_v56 = vmax.f32 %v890_v52, 0.0  ;;  %v1050_v57 = vmax.f32 %v922_v53, 0.0 }
  0xad   :  { %v1209_v58 = vpack.c.bf16 %v1081_v54, %v1081_v54  ;;  %v1573_v59 = vsel %vm1399_vm2, %v1081_v54, 0.0  ;;  %v1241_v60 = vpack.c.bf16 %v1113_v55, %v1113_v55  ;;  %v1657_v61 = vsel %vm1399_vm2, %v1113_v55, 0.0  ;;  %v600_v62 = vpop.f32.mrf.mxu2  ;;  %v680_v63 = vpop.f32.mrf.mxu3 }
  0xae   :  { %v1574_v0 = vadd.f32 %v1573_v59, %v1572_v30  ;;  %v1658_v1 = vadd.f32 %v1657_v61, %v1656_v37  ;;  %v1146_v2 = vpack.c.bf16 %v1018_v56, %v1018_v56  ;;  %v1407_v3 = vsel %vm1399_vm2, %v1018_v56, 0.0  ;;  %v442_v4 = vpop.f32.mrf.mxu0  ;;  %v522_v5 = vpop.f32.mrf.mxu1 }
  0xaf   :  { %1338 = vst.msk [vmem:[%s3504_s4 + $0x10c] sm:$0xf] %vm1270_vm1, %v1209_v58  ;;  %v1408_v6 = vadd.f32 %v1407_v3, %v1406_v44  ;;  %v1178_v7 = vpack.c.bf16 %v1050_v57, %v1050_v57  ;;  %v1491_v8 = vsel %vm1399_vm2, %v1050_v57, 0.0  ;;  %v822_v9 = vmul.f32 %v2150_v34, %v600_v62 }
  0xb0   :  { %1370 = vst.msk [vmem:[%s3504_s4 + $0x18c] sm:$0xf] %vm1270_vm1, %v1241_v60  ;;  %v1492_v10 = vadd.f32 %v1491_v8, %v1490_v45  ;;  %v854_v11 = vmul.f32 %v2150_v34, %v680_v63  ;;  %v759_v12 = vmul.f32 %v2150_v34, %v442_v4  ;;  %v791_v13 = vmul.f32 %v2150_v34, %v522_v5 }
  0xb1   :  { %1275 = vst.msk [vmem:[%s3504_s4 + $0x10] sm:$0xf] %vm1270_vm1, %v1146_v2  ;;  %v954_v16 = vadd.f32 %v2179_v43, %v822_v9  ;;  %v191_v37 = vpack.c.bf16 %v107_v23, %v106_v19  ;;  %v77_v23 = vld [vmem:[%s3501_s0 + $0x1c8] sm:$0xff] }
  0xb2   :  { %1307 = vst.msk [vmem:[%s3504_s4 + $0x90] sm:$0xf] %vm1270_vm1, %v1178_v7  ;;  %v986_v20 = vadd.f32 %v2179_v43, %v854_v11  ;;  %v891_v21 = vadd.f32 %v2179_v43, %v759_v12  ;;  %v923_v22 = vadd.f32 %v2179_v43, %v791_v13 }
  0xb3   :  { %v1082_v26 = vmax.f32 %v954_v16, 0.0  ;;  %v44_v16 = vld [vmem:[%s3501_s0 + $0xc0] sm:$0xff] }
  0xb4   :  { %v1114_v28 = vmax.f32 %v986_v20, 0.0  ;;  %v1019_v29 = vmax.f32 %v891_v21, 0.0  ;;  %v1051_v30 = vmax.f32 %v923_v22, 0.0 }
  0xb5   :  { %v1210_v32 = vpack.c.bf16 %v1082_v26, %v1082_v26  ;;  %v1575_v33 = vsel %vm1399_vm2, %v1082_v26, 0.0  ;;  %v602_v35 = vpop.f32.mrf.mxu2  ;;  %v682_v36 = vpop.f32.mrf.mxu3 }
  0xb6   :  { %v1576_v39 = vadd.f32 %v1575_v33, %v1574_v0  ;;  %v1242_v40 = vpack.c.bf16 %v1114_v28, %v1114_v28  ;;  %v1659_v41 = vsel %vm1399_vm2, %v1114_v28, 0.0  ;;  %v1147_v42 = vpack.c.bf16 %v1019_v29, %v1019_v29  ;;  %v445_v44 = vpop.f32.mrf.mxu0  ;;  %v525_v45 = vpop.f32.mrf.mxu1  ;;  %v141_v28 = vld [vmem:[%s3501_s0 + $0x3c8] sm:$0xff] }
  0xb7   :  { %1339 = vst.msk [vmem:[%s3504_s4 + $0x110] sm:$0xf] %vm1270_vm1, %v1210_v32  ;;  %v1660_v46 = vadd.f32 %v1659_v41, %v1658_v1  ;;  %v1409_v47 = vsel %vm1399_vm2, %v1019_v29, 0.0  ;;  %v1179_v48 = vpack.c.bf16 %v1051_v30, %v1051_v30  ;;  %v1493_v49 = vsel %vm1399_vm2, %v1051_v30, 0.0 }
  0xb8   :  { %1371 = vst.msk [vmem:[%s3504_s4 + $0x190] sm:$0xf] %vm1270_vm1, %v1242_v40  ;;  %v1410_v50 = vadd.f32 %v1409_v47, %v1408_v6  ;;  %v1494_v51 = vadd.f32 %v1493_v49, %v1492_v10  ;;  %v823_v52 = vmul.f32 %v2150_v34, %v602_v35  ;;  %v855_v53 = vmul.f32 %v2150_v34, %v682_v36 }
  0xb9   :  { %1276 = vst.msk [vmem:[%s3504_s4 + $0x14] sm:$0xf] %vm1270_vm1, %v1147_v42  ;;  %v760_v54 = vmul.f32 %v2150_v34, %v445_v44  ;;  %v792_v55 = vmul.f32 %v2150_v34, %v525_v45  ;;  %1820 = vmatmul.msk.bf16.gmra.mxu0 %vm228_vm0, %v159_v27  ;;  %1836 = vmatmul.msk.bf16.gmra.mxu1 %vm228_vm0, %v175_v31  ;;  %v140_v27 = vld [vmem:[%s3501_s0 + $0x3c0] sm:$0xff] }
  0xba   :  { %1308 = vst.msk [vmem:[%s3504_s4 + $0x94] sm:$0xf] %vm1270_vm1, %v1179_v48  ;;  %v955_v56 = vadd.f32 %v2179_v43, %v823_v52  ;;  %v987_v57 = vadd.f32 %v2179_v43, %v855_v53  ;;  %1852 = vmatmul.msk.bf16.gmra.mxu2 %vm228_vm0, %v191_v37  ;;  %1868 = vmatmul.msk.bf16.gmra.mxu3 %vm228_vm0, %v207_v38 }
  0xbb   :  { %v892_v58 = vadd.f32 %v2179_v43, %v760_v54  ;;  %v924_v59 = vadd.f32 %v2179_v43, %v792_v55  ;;  %v160_v33 = vpack.c.bf16 %v45_v17, %v44_v16  ;;  %v176_v35 = vpack.c.bf16 %v77_v23, %v76_v18  ;;  %v47_v23 = vld [vmem:[%s3501_s0 + $0xd8] sm:$0xff] }
  0xbc   :  { %v1083_v60 = vmax.f32 %v955_v56, 0.0  ;;  %v1115_v61 = vmax.f32 %v987_v57, 0.0  ;;  %v192_v36 = vpack.c.bf16 %v109_v25, %v108_v24  ;;  %v208_v42 = vpack.c.bf16 %v141_v28, %v140_v27  ;;  %v78_v27 = vld [vmem:[%s3501_s0 + $0x1d0] sm:$0xff]  ;;  %v79_v28 = vld [vmem:[%s3501_s0 + $0x1d8] sm:$0xff] }
  0xbd   :  { %v1020_v62 = vmax.f32 %v892_v58, 0.0  ;;  %v1052_v63 = vmax.f32 %v924_v59, 0.0  ;;  %v605_v0 = vpop.f32.mrf.mxu2  ;;  %v685_v1 = vpop.f32.mrf.mxu3 }
  0xbe   :  { %v1211_v2 = vpack.c.bf16 %v1083_v60, %v1083_v60  ;;  %v1577_v3 = vsel %vm1399_vm2, %v1083_v60, 0.0  ;;  %v1243_v4 = vpack.c.bf16 %v1115_v61, %v1115_v61  ;;  %v1661_v5 = vsel %vm1399_vm2, %v1115_v61, 0.0  ;;  %v447_v6 = vpop.f32.mrf.mxu0  ;;  %v527_v7 = vpop.f32.mrf.mxu1 }
  0xbf   :  { %v1578_v8 = vadd.f32 %v1577_v3, %v1576_v39  ;;  %v1662_v9 = vadd.f32 %v1661_v5, %v1660_v46  ;;  %v1148_v10 = vpack.c.bf16 %v1020_v62, %v1020_v62  ;;  %v1411_v11 = vsel %vm1399_vm2, %v1020_v62, 0.0 }
  0xc0   :  { %1340 = vst.msk [vmem:[%s3504_s4 + $0x114] sm:$0xf] %vm1270_vm1, %v1211_v2  ;;  %v1412_v12 = vadd.f32 %v1411_v11, %v1410_v50  ;;  %v1180_v13 = vpack.c.bf16 %v1052_v63, %v1052_v63  ;;  %v1495_v14 = vsel %vm1399_vm2, %v1052_v63, 0.0  ;;  %v824_v15 = vmul.f32 %v2150_v34, %v605_v0 }
  0xc1   :  { %1372 = vst.msk [vmem:[%s3504_s4 + $0x194] sm:$0xf] %vm1270_vm1, %v1243_v4  ;;  %v1496_v19 = vadd.f32 %v1495_v14, %v1494_v51  ;;  %v856_v20 = vmul.f32 %v2150_v34, %v685_v1  ;;  %v761_v21 = vmul.f32 %v2150_v34, %v447_v6  ;;  %v793_v22 = vmul.f32 %v2150_v34, %v527_v7 }
  0xc2   :  { %1277 = vst.msk [vmem:[%s3504_s4 + $0x18] sm:$0xf] %vm1270_vm1, %v1148_v10  ;;  %v956_v26 = vadd.f32 %v2179_v43, %v824_v15 }
  0xc3   :  { %1309 = vst.msk [vmem:[%s3504_s4 + $0x98] sm:$0xf] %vm1270_vm1, %v1180_v13  ;;  %v988_v29 = vadd.f32 %v2179_v43, %v856_v20  ;;  %v893_v30 = vadd.f32 %v2179_v43, %v761_v21  ;;  %v925_v31 = vadd.f32 %v2179_v43, %v793_v22  ;;  %v46_v22 = vld [vmem:[%s3501_s0 + $0xd0] sm:$0xff] }
  0xc4   :  { %v1084_v32 = vmax.f32 %v956_v26, 0.0 }
  0xc5   :  { %v1116_v37 = vmax.f32 %v988_v29, 0.0  ;;  %v1021_v38 = vmax.f32 %v893_v30, 0.0  ;;  %v1053_v39 = vmax.f32 %v925_v31, 0.0  ;;  %v607_v40 = vpop.f32.mrf.mxu2  ;;  %v687_v41 = vpop.f32.mrf.mxu3  ;;  %v110_v29 = vld [vmem:[%s3501_s0 + $0x2d0] sm:$0xff] }
  0xc6   :  { %v1212_v44 = vpack.c.bf16 %v1084_v32, %v1084_v32  ;;  %v1579_v45 = vsel %vm1399_vm2, %v1084_v32, 0.0  ;;  %v825_v46 = vmul.f32 %v2150_v34, %v607_v40  ;;  %v857_v47 = vmul.f32 %v2150_v34, %v687_v41  ;;  %v450_v48 = vpop.f32.mrf.mxu0  ;;  %v530_v49 = vpop.f32.mrf.mxu1 }
  0xc7   :  { %v1580_v50 = vadd.f32 %v1579_v45, %v1578_v8  ;;  %v1244_v51 = vpack.c.bf16 %v1116_v37, %v1116_v37  ;;  %v1663_v52 = vsel %vm1399_vm2, %v1116_v37, 0.0  ;;  %v1149_v53 = vpack.c.bf16 %v1021_v38, %v1021_v38 }
  0xc8   :  { %1341 = vst.msk [vmem:[%s3504_s4 + $0x118] sm:$0xf] %vm1270_vm1, %v1212_v44  ;;  %v1664_v54 = vadd.f32 %v1663_v52, %v1662_v9  ;;  %v1413_v55 = vsel %vm1399_vm2, %v1021_v38, 0.0  ;;  %v1181_v56 = vpack.c.bf16 %v1053_v39, %v1053_v39  ;;  %v1497_v57 = vsel %vm1399_vm2, %v1053_v39, 0.0 }
  0xc9   :  { %1373 = vst.msk [vmem:[%s3504_s4 + $0x198] sm:$0xf] %vm1270_vm1, %v1244_v51  ;;  %v2497_v58 = vadd.f32 %v1413_v55, %v1412_v12  ;;  %v2499_v59 = vadd.f32 %v1497_v57, %v1496_v19  ;;  %v957_v60 = vadd.f32 %v2179_v43, %v825_v46  ;;  %v989_v61 = vadd.f32 %v2179_v43, %v857_v47 }
  0xca   :  { %1278 = vst.msk [vmem:[%s3504_s4 + $0x1c] sm:$0xf] %vm1270_vm1, %v1149_v53  ;;  %v762_v62 = vmul.f32 %v2150_v34, %v450_v48  ;;  %v794_v63 = vmul.f32 %v2150_v34, %v530_v49  ;;  %1821 = vmatmul.msk.bf16.gmra.mxu0 %vm228_vm0, %v160_v33  ;;  %1837 = vmatmul.msk.bf16.gmra.mxu1 %vm228_vm0, %v176_v35  ;;  %v111_v33 = vld [vmem:[%s3501_s0 + $0x2d8] sm:$0xff]  ;;  %v142_v35 = vld [vmem:[%s3501_s0 + $0x3d0] sm:$0xff] }
  0xcb   :  { %1310 = vst.msk [vmem:[%s3504_s4 + $0x9c] sm:$0xf] %vm1270_vm1, %v1181_v56  ;;  %v1085_v0 = vmax.f32 %v957_v60, 0.0  ;;  %v1117_v1 = vmax.f32 %v989_v61, 0.0  ;;  %1853 = vmatmul.msk.bf16.gmra.mxu2 %vm228_vm0, %v192_v36  ;;  %1869 = vmatmul.msk.bf16.gmra.mxu3 %vm228_vm0, %v208_v42  ;;  %v143_v36 = vld [vmem:[%s3501_s0 + $0x3d8] sm:$0xff]  ;;  %v161_v41 = vpack.c.bf16 %v47_v23, %v46_v22  ;;  %v177_v44 = vpack.c.bf16 %v79_v28, %v78_v27 }
  0xcc   :  { %v894_v2 = vadd.f32 %v2179_v43, %v762_v62  ;;  %v926_v3 = vadd.f32 %v2179_v43, %v794_v63  ;;  %v193_v47 = vpack.c.bf16 %v111_v33, %v110_v29  ;;  %v209_v48 = vpack.c.bf16 %v143_v36, %v142_v35  ;;  %v113_v33 = vld [vmem:[%s3501_s0 + $0x2e8] sm:$0xff] }
  0xcd   :  { %v1213_v4 = vpack.c.bf16 %v1085_v0, %v1085_v0  ;;  %v1581_v5 = vsel %vm1399_vm2, %v1085_v0, 0.0  ;;  %v610_v6 = vpop.f32.mrf.mxu2  ;;  %v690_v7 = vpop.f32.mrf.mxu3  ;;  %v1245_v9 = vpack.c.bf16 %v1117_v1, %v1117_v1  ;;  %v1665_v10 = vsel %vm1399_vm2, %v1117_v1, 0.0 }
  0xce   :  { %v2520_v8 = vadd.f32 %v1581_v5, %v1580_v50  ;;  %v1022_v11 = vmax.f32 %v894_v2, 0.0  ;;  %v452_v12 = vpop.f32.mrf.mxu0  ;;  %v532_v13 = vpop.f32.mrf.mxu1  ;;  %v2527_v14 = vadd.f32 %v1665_v10, %v1664_v54  ;;  %v1054_v15 = vmax.f32 %v926_v3, 0.0 }
  0xcf   :  { %1342 = vst.msk [vmem:[%s3504_s4 + $0x11c] sm:$0xf] %vm1270_vm1, %v1213_v4  ;;  %v826_v17 = vmul.f32 %v2150_v34, %v610_v6  ;;  %v858_v20 = vmul.f32 %v2150_v34, %v690_v7  ;;  %v763_v21 = vmul.f32 %v2150_v34, %v452_v12  ;;  %v795_v26 = vmul.f32 %v2150_v34, %v532_v13 }
  0xd0   :  { %1374 = vst.msk [vmem:[%s3504_s4 + $0x19c] sm:$0xf] %vm1270_vm1, %v1245_v9  ;;  %v1150_v16 = vpack.c.bf16 %v1022_v11, %v1022_v11  ;;  %v1182_v18 = vpack.c.bf16 %v1054_v15, %v1054_v15  ;;  %v1421_v49 = vsel %vm1399_vm2, %v1022_v11, 0.0  ;;  %v1505_v53 = vsel %vm1399_vm2, %v1054_v15, 0.0 }
  0xd1   :  { %v958_v19 = vadd.f32 %v2179_v43, %v826_v17  ;;  %v990_v25 = vadd.f32 %v2179_v43, %v858_v20  ;;  %v895_v30 = vadd.f32 %v2179_v43, %v763_v21  ;;  %v927_v46 = vadd.f32 %v2179_v43, %v795_v26  ;;  %v2621_v26 = vld [vmem:[%s3501_s0 + $0x1e0] sm:$0xff] }
  0xd2   :  { %1279 = vst.msk [vmem:[%s3504_s4 + $0x20] sm:$0xf] %vm1270_vm1, %v1150_v16 }
  0xd3   :  { %1311 = vst.msk [vmem:[%s3504_s4 + $0xa0] sm:$0xf] %vm1270_vm1, %v1182_v18  ;;  %v1086_v24 = vmax.f32 %v958_v19, 0.0  ;;  %v1118_v38 = vmax.f32 %v990_v25, 0.0  ;;  %v1023_v42 = vmax.f32 %v895_v30, 0.0  ;;  %v1055_v55 = vmax.f32 %v927_v46, 0.0 }
  0xd4   :  { %v49_v25 = vld [vmem:[%s3501_s0 + $0xe8] sm:$0xff] }
  0xd5   :  { %v612_v31 = vpop.f32.mrf.mxu2  ;;  %v692_v32 = vpop.f32.mrf.mxu3  ;;  %v1214_v37 = vpack.c.bf16 %v1086_v24, %v1086_v24  ;;  %v1246_v45 = vpack.c.bf16 %v1118_v38, %v1118_v38  ;;  %v1151_v50 = vpack.c.bf16 %v1023_v42, %v1023_v42  ;;  %v1422_v51 = vsel %vm1399_vm2, %v1023_v42, 0.0 }
  0xd6   :  { %v455_v39 = vpop.f32.mrf.mxu0  ;;  %v535_v40 = vpop.f32.mrf.mxu1  ;;  %v827_v52 = vmul.f32 %v2150_v34, %v612_v31  ;;  %v1423_v54 = vadd.f32 %v1422_v51, %v1421_v49  ;;  %v859_v56 = vmul.f32 %v2150_v34, %v692_v32  ;;  %v1589_v62 = vsel %vm1399_vm2, %v1086_v24, 0.0  ;;  %v48_v24 = vld [vmem:[%s3501_s0 + $0xe0] sm:$0xff]  ;;  %v81_v31 = vld [vmem:[%s3501_s0 + $0x1e8] sm:$0xff] }
  0xd7   :  { %1343 = vst.msk [vmem:[%s3504_s4 + $0x120] sm:$0xf] %vm1270_vm1, %v1214_v37  ;;  %v764_v60 = vmul.f32 %v2150_v34, %v455_v39  ;;  %v796_v61 = vmul.f32 %v2150_v34, %v535_v40  ;;  %v1183_v63 = vpack.c.bf16 %v1055_v55, %v1055_v55  ;;  %v1506_v0 = vsel %vm1399_vm2, %v1055_v55, 0.0  ;;  %v112_v32 = vld [vmem:[%s3501_s0 + $0x2e0] sm:$0xff] }
  0xd8   :  { %1375 = vst.msk [vmem:[%s3504_s4 + $0x1a0] sm:$0xf] %vm1270_vm1, %v1246_v45  ;;  %v959_v57 = vadd.f32 %v2179_v43, %v827_v52  ;;  %v991_v1 = vadd.f32 %v2179_v43, %v859_v56  ;;  %v1673_v2 = vsel %vm1399_vm2, %v1118_v38, 0.0  ;;  %v1507_v3 = vadd.f32 %v1506_v0, %v1505_v53 }
  0xd9   :  { %1280 = vst.msk [vmem:[%s3504_s4 + $0x24] sm:$0xf] %vm1270_vm1, %v1151_v50  ;;  %v896_v5 = vadd.f32 %v2179_v43, %v764_v60  ;;  %v928_v10 = vadd.f32 %v2179_v43, %v796_v61  ;;  %v162_v45 = vpack.c.bf16 %v49_v25, %v48_v24  ;;  %v178_v46 = vpack.c.bf16 %v81_v31, %v2621_v26 }
  0xda   :  { %1822 = vmatmul.msk.bf16.gmra.mxu0 %vm228_vm0, %v161_v41  ;;  %1838 = vmatmul.msk.bf16.gmra.mxu1 %vm228_vm0, %v177_v44  ;;  %v1087_v4 = vmax.f32 %v959_v57, 0.0  ;;  %1312 = vst.msk [vmem:[%s3504_s4 + $0xa4] sm:$0xf] %vm1270_vm1, %v1183_v63  ;;  %v1119_v9 = vmax.f32 %v991_v1, 0.0  ;;  %v145_v63 = vld [vmem:[%s3501_s0 + $0x3e8] sm:$0xff] }
  0xdb   :  { %1854 = vmatmul.msk.bf16.gmra.mxu2 %vm228_vm0, %v193_v47  ;;  %1870 = vmatmul.msk.bf16.gmra.mxu3 %vm228_vm0, %v209_v48  ;;  %v1024_v18 = vmax.f32 %v896_v5, 0.0  ;;  %v1056_v23 = vmax.f32 %v928_v10, 0.0  ;;  %v194_v47 = vpack.c.bf16 %v113_v33, %v112_v32 }
  0xdc   :  { %v1215_v16 = vpack.c.bf16 %v1087_v4, %v1087_v4  ;;  %v1590_v17 = vsel %vm1399_vm2, %v1087_v4, 0.0  ;;  %v1247_v21 = vpack.c.bf16 %v1119_v9, %v1119_v9  ;;  %v1674_v22 = vsel %vm1399_vm2, %v1119_v9, 0.0 }
  0xdd   :  { %v615_v6 = vpop.f32.mrf.mxu2  ;;  %v695_v7 = vpop.f32.mrf.mxu3  ;;  %v1591_v20 = vadd.f32 %v1590_v17, %v1589_v62  ;;  %v1675_v27 = vadd.f32 %v1674_v22, %v1673_v2  ;;  %v1152_v28 = vpack.c.bf16 %v1024_v18, %v1024_v18  ;;  %v1424_v29 = vsel %vm1399_vm2, %v1024_v18, 0.0  ;;  %v144_v62 = vld [vmem:[%s3501_s0 + $0x3e0] sm:$0xff] }
  0xde   :  { %v828_v11 = vmul.f32 %v2150_v34, %v615_v6  ;;  %v860_v12 = vmul.f32 %v2150_v34, %v695_v7  ;;  %v457_v13 = vpop.f32.mrf.mxu0  ;;  %v537_v15 = vpop.f32.mrf.mxu1  ;;  %1344 = vst.msk [vmem:[%s3504_s4 + $0x124] sm:$0xf] %vm1270_vm1, %v1215_v16  ;;  %v1425_v35 = vadd.f32 %v1424_v29, %v1423_v54  ;;  %v1184_v36 = vpack.c.bf16 %v1056_v23, %v1056_v23 }
  0xdf   :  { %v765_v19 = vmul.f32 %v2150_v34, %v457_v13  ;;  %1376 = vst.msk [vmem:[%s3504_s4 + $0x1a4] sm:$0xf] %vm1270_vm1, %v1247_v21  ;;  %v1508_v37 = vsel %vm1399_vm2, %v1056_v23, 0.0  ;;  %v797_v42 = vmul.f32 %v2150_v34, %v537_v15 }
  0xe0   :  { %v960_v30 = vadd.f32 %v2179_v43, %v828_v11  ;;  %v992_v38 = vadd.f32 %v2179_v43, %v860_v12  ;;  %1281 = vst.msk [vmem:[%s3504_s4 + $0x28] sm:$0xf] %vm1270_vm1, %v1152_v28  ;;  %v1509_v39 = vadd.f32 %v1508_v37, %v1507_v3  ;;  %v210_v12 = vpack.c.bf16 %v145_v63, %v144_v62 }
  0xe1   :  { %v897_v41 = vadd.f32 %v2179_v43, %v765_v19  ;;  %1313 = vst.msk [vmem:[%s3504_s4 + $0xa8] sm:$0xf] %vm1270_vm1, %v1184_v36  ;;  %v929_v51 = vadd.f32 %v2179_v43, %v797_v42  ;;  %v50_v42 = vld [vmem:[%s3501_s0 + $0xf0] sm:$0xff] }
  0xe2   :  { %v1088_v40 = vmax.f32 %v960_v30, 0.0  ;;  %v1120_v44 = vmax.f32 %v992_v38, 0.0 }
  0xe3   :  { %v1025_v50 = vmax.f32 %v897_v41, 0.0  ;;  %v1057_v3 = vmax.f32 %v929_v51, 0.0 }
  0xe4   :  { %v1216_v48 = vpack.c.bf16 %v1088_v40, %v1088_v40  ;;  %v1592_v49 = vsel %vm1399_vm2, %v1088_v40, 0.0  ;;  %v1248_v55 = vpack.c.bf16 %v1120_v44, %v1120_v44  ;;  %v1676_v56 = vsel %vm1399_vm2, %v1120_v44, 0.0  ;;  %v51_v44 = vld [vmem:[%s3501_s0 + $0xf8] sm:$0xff] }
  0xe5   :  { %v617_v52 = vpop.f32.mrf.mxu2  ;;  %v697_v53 = vpop.f32.mrf.mxu3  ;;  %v1593_v54 = vadd.f32 %v1592_v49, %v1591_v20  ;;  %v1677_v0 = vadd.f32 %v1676_v56, %v1675_v27  ;;  %v1153_v1 = vpack.c.bf16 %v1025_v50, %v1025_v50  ;;  %v1426_v2 = vsel %vm1399_vm2, %v1025_v50, 0.0 }
  0xe6   :  { %v829_v57 = vmul.f32 %v2150_v34, %v617_v52  ;;  %v460_v60 = vpop.f32.mrf.mxu0  ;;  %v540_v61 = vpop.f32.mrf.mxu1  ;;  %1345 = vst.msk [vmem:[%s3504_s4 + $0x128] sm:$0xf] %vm1270_vm1, %v1216_v48  ;;  %v1427_v4 = vadd.f32 %v1426_v2, %v1425_v35  ;;  %v861_v6 = vmul.f32 %v2150_v34, %v697_v53  ;;  %v1185_v9 = vpack.c.bf16 %v1057_v3, %v1057_v3  ;;  %v2741_v48 = vld [vmem:[%s3503_s3] ss:$0 sm:$0xff]  ;;  %v115_v52 = vld [vmem:[%s3501_s0 + $0x2f8] sm:$0xff]  ;;  %v146_v53 = vld [vmem:[%s3501_s0 + $0x3f0] sm:$0xff] }
  0xe7   :  { %1377 = vst.msk [vmem:[%s3504_s4 + $0x1a8] sm:$0xf] %vm1270_vm1, %v1248_v55  ;;  %v766_v7 = vmul.f32 %v2150_v34, %v460_v60  ;;  %v1510_v10 = vsel %vm1399_vm2, %v1057_v3, 0.0  ;;  %v798_v11 = vmul.f32 %v2150_v34, %v540_v61  ;;  %v1415_v55 = vrot.slane %v2497_v58, 4 }
  0xe8   :  { %v961_v5 = vadd.f32 %v2179_v43, %v829_v57  ;;  %1282 = vst.msk [vmem:[%s3504_s4 + $0x2c] sm:$0xf] %vm1270_vm1, %v1153_v1  ;;  %v1511_v13 = vadd.f32 %v1510_v10, %v1509_v39  ;;  %v993_v16 = vadd.f32 %v2179_v43, %v861_v6  ;;  %v2710_v39 = vld [vmem:[%s3502_s2] ss:$0 sm:$0xff]  ;;  %v163_v62 = vpack.c.bf16 %v51_v44, %v50_v42 }
  0xe9   :  { %v898_v17 = vadd.f32 %v2179_v43, %v766_v7  ;;  %1314 = vst.msk [vmem:[%s3504_s4 + $0xac] sm:$0xf] %vm1270_vm1, %v1185_v9  ;;  %v930_v18 = vadd.f32 %v2179_v43, %v798_v11 }
  0xea   :  { %v1089_v15 = vmax.f32 %v961_v5, 0.0  ;;  %1823 = vmatmul.msk.bf16.gmra.mxu0 %vm228_vm0, %v162_v45  ;;  %v1121_v21 = vmax.f32 %v993_v16, 0.0  ;;  %1839 = vmatmul.msk.bf16.gmra.mxu1 %vm228_vm0, %v178_v46  ;;  %v82_v45 = vld [vmem:[%s3501_s0 + $0x1f0] sm:$0xff]  ;;  %v83_v46 = vld [vmem:[%s3501_s0 + $0x1f8] sm:$0xff] }
  0xeb   :  { %v1026_v22 = vmax.f32 %v898_v17, 0.0  ;;  %1855 = vmatmul.msk.bf16.gmra.mxu2 %vm228_vm0, %v194_v47  ;;  %v1058_v24 = vmax.f32 %v930_v18, 0.0  ;;  %1871 = vmatmul.msk.bf16.gmra.mxu3 %vm228_vm0, %v210_v12  ;;  %v114_v47 = vld [vmem:[%s3501_s0 + $0x2f0] sm:$0xff]  ;;  %v179_v2 = vpack.c.bf16 %v83_v46, %v82_v45 }
  0xec   :  { %v1217_v19 = vpack.c.bf16 %v1089_v15, %v1089_v15  ;;  %v1594_v20 = vsel %vm1399_vm2, %v1089_v15, 0.0  ;;  %v1249_v43 = vpack.c.bf16 %v1121_v21, %v1121_v21  ;;  %v1678_v27 = vsel %vm1399_vm2, %v1121_v21, 0.0 }
  0xed   :  { %v1595_v23 = vadd.f32 %v1594_v20, %v1593_v54  ;;  %v620_v25 = vpop.f32.mrf.mxu2  ;;  %v700_v26 = vpop.f32.mrf.mxu3  ;;  %v1154_v28 = vpack.c.bf16 %v1026_v22, %v1026_v22  ;;  %v1428_v29 = vsel %vm1399_vm2, %v1026_v22, 0.0  ;;  %v1679_v32 = vadd.f32 %v1678_v27, %v1677_v0  ;;  %v147_v54 = vld [vmem:[%s3501_s0 + $0x3f8] sm:$0xff] }
  0xee   :  { %1346 = vst.msk [vmem:[%s3504_s4 + $0x12c] sm:$0xf] %vm1270_vm1, %v1217_v19  ;;  %v462_v30 = vpop.f32.mrf.mxu0  ;;  %v542_v31 = vpop.f32.mrf.mxu1  ;;  %v1429_v33 = vadd.f32 %v1428_v29, %v1427_v4  ;;  %v1186_v35 = vpack.c.bf16 %v1058_v24, %v1058_v24  ;;  %v1512_v36 = vsel %vm1399_vm2, %v1058_v24, 0.0  ;;  %v830_v38 = vmul.f32 %v2150_v34, %v620_v25 }
  0xef   :  { %1378 = vst.msk [vmem:[%s3504_s4 + $0x1ac] sm:$0xf] %vm1270_vm1, %v1249_v43  ;;  %v1513_v37 = vadd.f32 %v1512_v36, %v1511_v13  ;;  %v862_v40 = vmul.f32 %v2710_v39, %v700_v26  ;;  %v767_v41 = vmul.f32 %v2710_v39, %v462_v30  ;;  %v799_v34 = vmul.f32 %v2710_v39, %v542_v31 }
  0xf0   :  { %1283 = vst.msk [vmem:[%s3504_s4 + $0x30] sm:$0xf] %vm1270_vm1, %v1154_v28  ;;  %v962_v49 = vadd.f32 %v2741_v48, %v830_v38  ;;  %v195_v3 = vpack.c.bf16 %v115_v52, %v114_v47  ;;  %v211_v4 = vpack.c.bf16 %v147_v54, %v146_v53  ;;  %v2787_v28 = vadd.f32 %v1415_v55, %v2497_v58 }
  0xf1   :  { %1315 = vst.msk [vmem:[%s3504_s4 + $0xb0] sm:$0xf] %vm1270_vm1, %v1186_v35  ;;  %v994_v50 = vadd.f32 %v2741_v48, %v862_v40  ;;  %v899_v51 = vadd.f32 %v2741_v48, %v767_v41  ;;  %v931_v56 = vadd.f32 %v2741_v48, %v799_v34  ;;  %v1583_v30 = vrot.slane %v2520_v8, 4 }
  0xf2   :  { %v1090_v57 = vmax.f32 %v962_v49, 0.0 }
  0xf3   :  { %v1122_v60 = vmax.f32 %v994_v50, 0.0  ;;  %v1027_v61 = vmax.f32 %v899_v51, 0.0  ;;  %v1059_v63 = vmax.f32 %v931_v56, 0.0 }
  0xf4   :  { %v1218_v5 = vpack.c.bf16 %v1090_v57, %v1090_v57  ;;  %v1596_v6 = vsel %vm1399_vm2, %v1090_v57, 0.0 }
  0xf5   :  { %v622_v0 = vpop.f32.mrf.mxu2  ;;  %v702_v1 = vpop.f32.mrf.mxu3  ;;  %v1250_v7 = vpack.c.bf16 %v1122_v60, %v1122_v60  ;;  %v1680_v9 = vsel %vm1399_vm2, %v1122_v60, 0.0  ;;  %v1597_v12 = vadd.f32 %v1596_v6, %v1595_v23  ;;  %v1155_v15 = vpack.c.bf16 %v1027_v61, %v1027_v61 }
  0xf6   :  { %v465_v10 = vpop.f32.mrf.mxu0  ;;  %v545_v11 = vpop.f32.mrf.mxu1  ;;  %v1681_v13 = vadd.f32 %v1680_v9, %v1679_v32  ;;  %v1430_v16 = vsel %vm1399_vm2, %v1027_v61, 0.0  ;;  %1347 = vst.msk [vmem:[%s3504_s4 + $0x130] sm:$0xf] %vm1270_vm1, %v1218_v5  ;;  %v1187_v18 = vpack.c.bf16 %v1059_v63, %v1059_v63  ;;  %v1514_v19 = vsel %vm1399_vm2, %v1059_v63, 0.0 }
  0xf7   :  { %v1431_v17 = vadd.f32 %v1430_v16, %v1429_v33  ;;  %v831_v20 = vmul.f32 %v2710_v39, %v622_v0  ;;  %1379 = vst.msk [vmem:[%s3504_s4 + $0x1b0] sm:$0xf] %vm1270_vm1, %v1250_v7  ;;  %v1515_v21 = vadd.f32 %v1514_v19, %v1513_v37  ;;  %v863_v22 = vmul.f32 %v2710_v39, %v702_v1 }
  0xf8   :  { %v768_v23 = vmul.f32 %v2710_v39, %v465_v10  ;;  %v800_v24 = vmul.f32 %v2710_v39, %v545_v11  ;;  %1284 = vst.msk [vmem:[%s3504_s4 + $0x34] sm:$0xf] %vm1270_vm1, %v1155_v15  ;;  %v1584_v63 = vadd.f32 %v1583_v30, %v2520_v8 }
  0xf9   :  { %v963_v25 = vadd.f32 %v2741_v48, %v831_v20  ;;  %1316 = vst.msk [vmem:[%s3504_s4 + $0xb4] sm:$0xf] %vm1270_vm1, %v1187_v18  ;;  %v995_v26 = vadd.f32 %v2741_v48, %v863_v22 }
  0xfa   :  { %1824 = vmatmul.msk.bf16.gmra.mxu0 %vm228_vm0, %v163_v62  ;;  %v900_v43 = vadd.f32 %v2741_v48, %v768_v23  ;;  %v932_v27 = vadd.f32 %v2741_v48, %v800_v24  ;;  %1840 = vmatmul.msk.bf16.gmra.mxu1 %vm228_vm0, %v179_v2  ;;  %v1417_v62 = vrot.slane %v2787_v28, 2  ;;  %v1585_v30 = vrot.slane %v1584_v63, 2 }
  0xfb   :  { %v1091_v29 = vmax.f32 %v963_v25, 0.0  ;;  %1856 = vmatmul.msk.bf16.gmra.mxu2 %vm228_vm0, %v195_v3  ;;  %v1123_v31 = vmax.f32 %v995_v26, 0.0  ;;  %1872 = vmatmul.msk.bf16.gmra.mxu3 %vm228_vm0, %v211_v4 }
  0xfc   :  { %v1028_v32 = vmax.f32 %v900_v43, 0.0  ;;  %v1060_v33 = vmax.f32 %v932_v27, 0.0  ;;  %v1418_v43 = vadd.f32 %v1417_v62, %v2787_v28 }
  0xfd   :  { %v625_v35 = vpop.f32.mrf.mxu2  ;;  %v705_v36 = vpop.f32.mrf.mxu3  ;;  %v1219_v37 = vpack.c.bf16 %v1091_v29, %v1091_v29  ;;  %v1598_v38 = vsel %vm1399_vm2, %v1091_v29, 0.0  ;;  %v1251_v34 = vpack.c.bf16 %v1123_v31, %v1123_v31  ;;  %v1682_v45 = vsel %vm1399_vm2, %v1123_v31, 0.0 }
  0xfe   :  { %v832_v58 = vmul.f32 %v2710_v39, %v625_v35  ;;  %v864_v40 = vmul.f32 %v2710_v39, %v705_v36  ;;  %v467_v41 = vpop.f32.mrf.mxu0  ;;  %v547_v42 = vpop.f32.mrf.mxu1  ;;  %v1599_v44 = vadd.f32 %v1598_v38, %v1597_v12  ;;  %v1156_v46 = vpack.c.bf16 %v1028_v32, %v1028_v32 }
  0xff   :  { %1348 = vst.msk [vmem:[%s3504_s4 + $0x134] sm:$0xf] %vm1270_vm1, %v1219_v37  ;;  %v1683_v47 = vadd.f32 %v1682_v45, %v1681_v13  ;;  %v1432_v49 = vsel %vm1399_vm2, %v1028_v32, 0.0  ;;  %v1188_v50 = vpack.c.bf16 %v1060_v33, %v1060_v33  ;;  %v1516_v51 = vsel %vm1399_vm2, %v1060_v33, 0.0 }
 0x100   :  { %1380 = vst.msk [vmem:[%s3504_s4 + $0x1b4] sm:$0xf] %vm1270_vm1, %v1251_v34  ;;  %v1433_v52 = vadd.f32 %v1432_v49, %v1431_v17  ;;  %v1517_v53 = vadd.f32 %v1516_v51, %v1515_v21  ;;  %v964_v54 = vadd.f32 %v2741_v48, %v832_v58  ;;  %v996_v55 = vadd.f32 %v2741_v48, %v864_v40 }
 0x101   :  { %1285 = vst.msk [vmem:[%s3504_s4 + $0x38] sm:$0xf] %vm1270_vm1, %v1156_v46  ;;  %v769_v56 = vmul.f32 %v2710_v39, %v467_v41  ;;  %v801_v57 = vmul.f32 %v2710_v39, %v547_v42  ;;  %v1586_v49 = vadd.f32 %v1585_v30, %v1584_v63 }
 0x102   :  { %1317 = vst.msk [vmem:[%s3504_s4 + $0xb8] sm:$0xf] %vm1270_vm1, %v1188_v50  ;;  %v1092_v60 = vmax.f32 %v964_v54, 0.0  ;;  %v1124_v61 = vmax.f32 %v996_v55, 0.0 }
 0x103   :  { %v901_v0 = vadd.f32 %v2741_v48, %v769_v56  ;;  %v933_v1 = vadd.f32 %v2741_v48, %v801_v57 }
 0x104   :  { %v1220_v2 = vpack.c.bf16 %v1092_v60, %v1092_v60  ;;  %v1600_v3 = vsel %vm1399_vm2, %v1092_v60, 0.0  ;;  %v1252_v4 = vpack.c.bf16 %v1124_v61, %v1124_v61  ;;  %v1684_v5 = vsel %vm1399_vm2, %v1124_v61, 0.0 }
 0x105   :  { %v627_v6 = vpop.f32.mrf.mxu2  ;;  %v707_v7 = vpop.f32.mrf.mxu3  ;;  %v1601_v9 = vadd.f32 %v1600_v3, %v1599_v44  ;;  %v1685_v10 = vadd.f32 %v1684_v5, %v1683_v47  ;;  %v1029_v11 = vmax.f32 %v901_v0, 0.0  ;;  %v1061_v12 = vmax.f32 %v933_v1, 0.0 }
 0x106   :  { %v470_v13 = vpop.f32.mrf.mxu0  ;;  %v550_v15 = vpop.f32.mrf.mxu1  ;;  %1349 = vst.msk [vmem:[%s3504_s4 + $0x138] sm:$0xf] %vm1270_vm1, %v1220_v2  ;;  %v833_v8 = vmul.f32 %v2710_v39, %v627_v6  ;;  %v865_v16 = vmul.f32 %v2710_v39, %v707_v7  ;;  %v1419_v47 = vrot.slane %v1418_v43, 1  ;;  %v1587_v0 = vrot.slane %v1586_v49, 1 }
 0x107   :  { %v770_v17 = vmul.f32 %v2710_v39, %v470_v13  ;;  %v802_v18 = vmul.f32 %v2710_v39, %v550_v15  ;;  %1381 = vst.msk [vmem:[%s3504_s4 + $0x1b8] sm:$0xf] %vm1270_vm1, %v1252_v4  ;;  %v1157_v19 = vpack.c.bf16 %v1029_v11, %v1029_v11  ;;  %v1434_v20 = vsel %vm1399_vm2, %v1029_v11, 0.0 }
 0x108   :  { %v1189_v21 = vpack.c.bf16 %v1061_v12, %v1061_v12  ;;  %v1518_v22 = vsel %vm1399_vm2, %v1061_v12, 0.0  ;;  %v1435_v23 = vadd.f32 %v1434_v20, %v1433_v52  ;;  %v965_v25 = vadd.f32 %v2741_v48, %v833_v8 }
 0x109   :  { %v2839_v24 = vadd.f32 %v1518_v22, %v1517_v53  ;;  %v997_v26 = vadd.f32 %v2741_v48, %v865_v16  ;;  %1286 = vst.msk [vmem:[%s3504_s4 + $0x3c] sm:$0xf] %vm1270_vm1, %v1157_v19  ;;  %v902_v27 = vadd.f32 %v2741_v48, %v770_v17  ;;  %v934_v29 = vadd.f32 %v2741_v48, %v802_v18 }
 0x10a   :  { %v1436_v31 = vrot.slane %v1435_v23, 4  ;;  %1318 = vst.msk [vmem:[%s3504_s4 + $0xbc] sm:$0xf] %vm1270_vm1, %v1189_v21  ;;  %v1093_v32 = vmax.f32 %v965_v25, 0.0  ;;  %v1420_v63 = vadd.f32 %v1419_v47, %v1418_v43  ;;  %v1588_v18 = vadd.f32 %v1587_v0, %v1586_v49 }
 0x10b   :  { %v1125_v33 = vmax.f32 %v997_v26, 0.0  ;;  %v1030_v35 = vmax.f32 %v902_v27, 0.0  ;;  %v1062_v28 = vmax.f32 %v934_v29, 0.0 }
 0x10c   :  { %v1437_v36 = vadd.f32 %v1436_v31, %v1435_v23  ;;  %v1221_v37 = vpack.c.bf16 %v1093_v32, %v1093_v32  ;;  %v1602_v38 = vsel %vm1399_vm2, %v1093_v32, 0.0  ;;  %v1736_v17 = vmul.f32 0.015625, %v1420_v63 }
 0x10d   :  { %v630_v58 = vpop.f32.mrf.mxu2  ;;  %v710_v40 = vpop.f32.mrf.mxu3  ;;  %v1603_v41 = vadd.f32 %v1602_v38, %v1601_v9  ;;  %v1253_v42 = vpack.c.bf16 %v1125_v33, %v1125_v33  ;;  %v1686_v44 = vsel %vm1399_vm2, %v1125_v33, 0.0  ;;  %v1158_v34 = vpack.c.bf16 %v1030_v35, %v1030_v35 }
 0x10e   :  { %v472_v45 = vpop.f32.mrf.mxu0  ;;  %v552_v46 = vpop.f32.mrf.mxu1  ;;  %v1438_v50 = vrot.slane %v1437_v36, 2  ;;  %1350 = vst.msk [vmem:[%s3504_s4 + $0x13c] sm:$0xf] %vm1270_vm1, %v1221_v37  ;;  %v2860_v51 = vadd.f32 %v1686_v44, %v1685_v10  ;;  %v1190_v53 = vpack.c.bf16 %v1062_v28, %v1062_v28  ;;  %v834_v54 = vmul.f32 %v2710_v39, %v630_v58 }
 0x10f   :  { %v1604_v52 = vrot.slane %v1603_v41, 4  ;;  %1382 = vst.msk [vmem:[%s3504_s4 + $0x1bc] sm:$0xf] %vm1270_vm1, %v1253_v42  ;;  %v866_v56 = vmul.f32 %v2710_v39, %v710_v40  ;;  %v771_v61 = vmul.f32 %v2710_v39, %v472_v45  ;;  %v803_v62 = vmul.f32 %v2710_v39, %v552_v46 }
 0x110   :  { %v1439_v55 = vadd.f32 %v1438_v50, %v1437_v36  ;;  %1287 = vst.msk [vmem:[%s3504_s4 + $0x40] sm:$0xf] %vm1270_vm1, %v1158_v34  ;;  %v966_v60 = vadd.f32 %v2741_v48, %v834_v54  ;;  %v1442_v22 = vsel %vm1399_vm2, %v1030_v35, 0.0  ;;  %v1526_v43 = vsel %vm1399_vm2, %v1062_v28, 0.0 }
 0x111   :  { %v1605_v57 = vadd.f32 %v1604_v52, %v1603_v41  ;;  %1319 = vst.msk [vmem:[%s3504_s4 + $0xc0] sm:$0xf] %vm1270_vm1, %v1190_v53  ;;  %v998_v2 = vadd.f32 %v2741_v48, %v866_v56  ;;  %v903_v5 = vadd.f32 %v2741_v48, %v771_v61  ;;  %v935_v9 = vadd.f32 %v2741_v48, %v803_v62 }
 0x112   :  { %v1440_v1 = vrot.slane %v1439_v55, 1  ;;  %v1094_v4 = vmax.f32 %v966_v60, 0.0  ;;  %v1744_v35 = vmul.f32 0.015625, %v1588_v18 }
 0x113   :  { %v1606_v3 = vrot.slane %v1605_v57, 2  ;;  %v1126_v7 = vmax.f32 %v998_v2, 0.0  ;;  %v1031_v15 = vmax.f32 %v903_v5, 0.0  ;;  %v1063_v29 = vmax.f32 %v935_v9, 0.0 }
 0x114   :  { %v1441_v6 = vadd.f32 %v1440_v1, %v1439_v55  ;;  %v1222_v13 = vpack.c.bf16 %v1094_v4, %v1094_v4  ;;  %v1610_v42 = vsel %vm1399_vm2, %v1094_v4, 0.0 }
 0x115   :  { %v632_v10 = vpop.f32.mrf.mxu2  ;;  %v712_v11 = vpop.f32.mrf.mxu3  ;;  %v1607_v12 = vadd.f32 %v1606_v3, %v1605_v57  ;;  %v1254_v20 = vpack.c.bf16 %v1126_v7, %v1126_v7  ;;  %v1159_v23 = vpack.c.bf16 %v1031_v15, %v1031_v15  ;;  %v1443_v25 = vsel %vm1399_vm2, %v1031_v15, 0.0 }
 0x116   :  { %v475_v8 = vpop.f32.mrf.mxu0  ;;  %v555_v16 = vpop.f32.mrf.mxu1  ;;  %v1737_v19 = vmul.f32 0.015625, %v1441_v6  ;;  %1351 = vst.msk [vmem:[%s3504_s4 + $0x140] sm:$0xf] %vm1270_vm1, %v1222_v13  ;;  %v1444_v27 = vadd.f32 %v1443_v25, %v1442_v22  ;;  %v835_v31 = vmul.f32 %v2710_v39, %v632_v10  ;;  %v867_v32 = vmul.f32 %v2710_v39, %v712_v11 }
 0x117   :  { %v1608_v21 = vrot.slane %v1607_v12, 1  ;;  %1383 = vst.msk [vmem:[%s3504_s4 + $0x1c0] sm:$0xf] %vm1270_vm1, %v1254_v20  ;;  %v772_v33 = vmul.f32 %v2710_v39, %v475_v8  ;;  %v1191_v28 = vpack.c.bf16 %v1063_v29, %v1063_v29  ;;  %v1527_v36 = vsel %vm1399_vm2, %v1063_v29, 0.0 }
 0x118   :  { %v2889_v26 = vsel %vm1768_vm3, %v1737_v19, %v1736_v17  ;;  %1288 = vst.msk [vmem:[%s3504_s4 + $0x44] sm:$0xf] %vm1270_vm1, %v1159_v23  ;;  %v804_v37 = vmul.f32 %v2710_v39, %v555_v16  ;;  %v1528_v58 = vadd.f32 %v1527_v36, %v1526_v43  ;;  %v967_v40 = vadd.f32 %v2741_v48, %v835_v31 }
 0x119   :  { %v1609_v30 = vadd.f32 %v1608_v21, %v1607_v12  ;;  %v999_v41 = vadd.f32 %v2741_v48, %v867_v32  ;;  %v1694_v44 = vsel %vm1399_vm2, %v1126_v7, 0.0  ;;  %1320 = vst.msk [vmem:[%s3504_s4 + $0xc4] sm:$0xf] %vm1270_vm1, %v1191_v28  ;;  %v904_v34 = vadd.f32 %v2741_v48, %v772_v33 }
 0x11a   :  { %v936_v45 = vadd.f32 %v2741_v48, %v804_v37  ;;  %v1095_v50 = vmax.f32 %v967_v40, 0.0 }
 0x11b   :  { %v1745_v38 = vmul.f32 0.015625, %v1609_v30  ;;  %v1127_v52 = vmax.f32 %v999_v41, 0.0  ;;  %v1032_v56 = vmax.f32 %v904_v34, 0.0 }
 0x11c   :  { %v1064_v57 = vmax.f32 %v936_v45, 0.0  ;;  %v1223_v62 = vpack.c.bf16 %v1095_v50, %v1095_v50  ;;  %v1611_v63 = vsel %vm1399_vm2, %v1095_v50, 0.0 }
 0x11d   :  { %v635_v46 = vpop.f32.mrf.mxu2  ;;  %v715_v47 = vpop.f32.mrf.mxu3  ;;  %v2916_v49 = vsel %vm1768_vm3, %v1745_v38, %v1744_v35  ;;  %v1255_v0 = vpack.c.bf16 %v1127_v52, %v1127_v52  ;;  %v1695_v1 = vsel %vm1399_vm2, %v1127_v52, 0.0  ;;  %v1612_v2 = vadd.f32 %v1611_v63, %v1610_v42 }
 0x11e   :  { %v836_v53 = vmul.f32 %v2710_v39, %v635_v46  ;;  %v477_v54 = vpop.f32.mrf.mxu0  ;;  %v557_v55 = vpop.f32.mrf.mxu1  ;;  %v868_v60 = vmul.f32 %v2710_v39, %v715_v47  ;;  %v1696_v3 = vadd.f32 %v1695_v1, %v1694_v44  ;;  %v1160_v4 = vpack.c.bf16 %v1032_v56, %v1032_v56  ;;  %1352 = vst.msk [vmem:[%s3504_s4 + $0x144] sm:$0xf] %vm1270_vm1, %v1223_v62 }
 0x11f   :  { %v773_v61 = vmul.f32 %v2710_v39, %v477_v54  ;;  %v1445_v5 = vsel %vm1399_vm2, %v1032_v56, 0.0  ;;  %v1192_v7 = vpack.c.bf16 %v1064_v57, %v1064_v57  ;;  %v1529_v9 = vsel %vm1399_vm2, %v1064_v57, 0.0  ;;  %1384 = vst.msk [vmem:[%s3504_s4 + $0x1c4] sm:$0xf] %vm1270_vm1, %v1255_v0 }
 0x120   :  { %v1446_v6 = vadd.f32 %v1445_v5, %v1444_v27  ;;  %v968_v10 = vadd.f32 %v2741_v48, %v836_v53  ;;  %v1530_v11 = vadd.f32 %v1529_v9, %v1528_v58  ;;  %v1000_v12 = vadd.f32 %v2741_v48, %v868_v60  ;;  %1289 = vst.msk [vmem:[%s3504_s4 + $0x48] sm:$0xf] %vm1270_vm1, %v1160_v4 }
 0x121   :  { %v905_v13 = vadd.f32 %v2741_v48, %v773_v61  ;;  %v805_v15 = vmul.f32 %v2710_v39, %v557_v55  ;;  %1321 = vst.msk [vmem:[%s3504_s4 + $0xc8] sm:$0xf] %vm1270_vm1, %v1192_v7 }
 0x122   :  { %v1096_v8 = vmax.f32 %v968_v10, 0.0  ;;  %v1128_v16 = vmax.f32 %v1000_v12, 0.0 }
 0x123   :  { %v1033_v17 = vmax.f32 %v905_v13, 0.0  ;;  %v937_v18 = vadd.f32 %v2741_v48, %v805_v15 }
 0x124   :  { %v1224_v21 = vpack.c.bf16 %v1096_v8, %v1096_v8  ;;  %v1613_v22 = vsel %vm1399_vm2, %v1096_v8, 0.0  ;;  %v1256_v30 = vpack.c.bf16 %v1128_v16, %v1128_v16  ;;  %v1697_v31 = vsel %vm1399_vm2, %v1128_v16, 0.0 }
 0x125   :  { %v637_v19 = vpop.f32.mrf.mxu2  ;;  %v717_v20 = vpop.f32.mrf.mxu3  ;;  %v1614_v29 = vadd.f32 %v1613_v22, %v1612_v2  ;;  %v1161_v32 = vpack.c.bf16 %v1033_v17, %v1033_v17  ;;  %v1698_v33 = vadd.f32 %v1697_v31, %v1696_v3  ;;  %v1447_v35 = vsel %vm1399_vm2, %v1033_v17, 0.0 }
 0x126   :  { %v837_v23 = vmul.f32 %v2710_v39, %v637_v19  ;;  %v869_v25 = vmul.f32 %v2710_v39, %v717_v20  ;;  %v480_v43 = vpop.f32.mrf.mxu0  ;;  %v560_v27 = vpop.f32.mrf.mxu1  ;;  %1353 = vst.msk [vmem:[%s3504_s4 + $0x148] sm:$0xf] %vm1270_vm1, %v1224_v21  ;;  %v1065_v28 = vmax.f32 %v937_v18, 0.0  ;;  %v1448_v37 = vadd.f32 %v1447_v35, %v1446_v6 }
 0x127   :  { %1385 = vst.msk [vmem:[%s3504_s4 + $0x1c8] sm:$0xf] %vm1270_vm1, %v1256_v30  ;;  %v774_v58 = vmul.f32 %v2710_v39, %v480_v43  ;;  %v806_v40 = vmul.f32 %v2710_v39, %v560_v27 }
 0x128   :  { %v969_v36 = vadd.f32 %v2741_v48, %v837_v23  ;;  %v1001_v38 = vadd.f32 %v2741_v48, %v869_v25  ;;  %1290 = vst.msk [vmem:[%s3504_s4 + $0x4c] sm:$0xf] %vm1270_vm1, %v1161_v32  ;;  %v1193_v41 = vpack.c.bf16 %v1065_v28, %v1065_v28  ;;  %v1531_v42 = vsel %vm1399_vm2, %v1065_v28, 0.0 }
 0x129   :  { %v1532_v34 = vadd.f32 %v1531_v42, %v1530_v11  ;;  %v906_v46 = vadd.f32 %v2741_v48, %v774_v58  ;;  %v938_v47 = vadd.f32 %v2741_v48, %v806_v40 }
 0x12a   :  { %v1097_v44 = vmax.f32 %v969_v36, 0.0  ;;  %v1129_v45 = vmax.f32 %v1001_v38, 0.0  ;;  %1322 = vst.msk [vmem:[%s3504_s4 + $0xcc] sm:$0xf] %vm1270_vm1, %v1193_v41 }
 0x12b   :  { %v1034_v56 = vmax.f32 %v906_v46, 0.0  ;;  %v1066_v62 = vmax.f32 %v938_v47, 0.0 }
 0x12c   :  { %v1225_v50 = vpack.c.bf16 %v1097_v44, %v1097_v44  ;;  %v1615_v52 = vsel %vm1399_vm2, %v1097_v44, 0.0  ;;  %v1257_v54 = vpack.c.bf16 %v1129_v45, %v1129_v45  ;;  %v1699_v55 = vsel %vm1399_vm2, %v1129_v45, 0.0 }
 0x12d   :  { %v1616_v53 = vadd.f32 %v1615_v52, %v1614_v29  ;;  %v640_v57 = vpop.f32.mrf.mxu2  ;;  %v720_v60 = vpop.f32.mrf.mxu3  ;;  %v1700_v61 = vadd.f32 %v1699_v55, %v1698_v33  ;;  %v1162_v3 = vpack.c.bf16 %v1034_v56, %v1034_v56  ;;  %v1449_v4 = vsel %vm1399_vm2, %v1034_v56, 0.0 }
 0x12e   :  { %1354 = vst.msk [vmem:[%s3504_s4 + $0x14c] sm:$0xf] %vm1270_vm1, %v1225_v50  ;;  %v838_v63 = vmul.f32 %v2710_v39, %v640_v57  ;;  %v870_v0 = vmul.f32 %v2710_v39, %v720_v60  ;;  %v482_v1 = vpop.f32.mrf.mxu0  ;;  %v562_v2 = vpop.f32.mrf.mxu1  ;;  %v1450_v7 = vadd.f32 %v1449_v4, %v1448_v37  ;;  %v1194_v9 = vpack.c.bf16 %v1066_v62, %v1066_v62 }
 0x12f   :  { %1386 = vst.msk [vmem:[%s3504_s4 + $0x1cc] sm:$0xf] %vm1270_vm1, %v1257_v54  ;;  %v775_v5 = vmul.f32 %v2710_v39, %v482_v1  ;;  %v807_v6 = vmul.f32 %v2710_v39, %v562_v2  ;;  %v1533_v10 = vsel %vm1399_vm2, %v1066_v62, 0.0 }
 0x130   :  { %v970_v11 = vadd.f32 %v2741_v48, %v838_v63  ;;  %1291 = vst.msk [vmem:[%s3504_s4 + $0x50] sm:$0xf] %vm1270_vm1, %v1162_v3  ;;  %v1534_v12 = vadd.f32 %v1533_v10, %v1532_v34  ;;  %v1002_v13 = vadd.f32 %v2741_v48, %v870_v0 }
 0x131   :  { %v907_v15 = vadd.f32 %v2741_v48, %v775_v5  ;;  %v939_v8 = vadd.f32 %v2741_v48, %v807_v6  ;;  %1323 = vst.msk [vmem:[%s3504_s4 + $0xd0] sm:$0xf] %vm1270_vm1, %v1194_v9 }
 0x132   :  { %v1098_v16 = vmax.f32 %v970_v11, 0.0  ;;  %v1130_v17 = vmax.f32 %v1002_v13, 0.0 }
 0x133   :  { %v1035_v18 = vmax.f32 %v907_v15, 0.0  ;;  %v1067_v19 = vmax.f32 %v939_v8, 0.0 }
 0x134   :  { %v1226_v20 = vpack.c.bf16 %v1098_v16, %v1098_v16  ;;  %v1617_v21 = vsel %vm1399_vm2, %v1098_v16, 0.0  ;;  %v1258_v23 = vpack.c.bf16 %v1130_v17, %v1130_v17  ;;  %v1701_v25 = vsel %vm1399_vm2, %v1130_v17, 0.0 }
 0x135   :  { %v1618_v22 = vadd.f32 %v1617_v21, %v1616_v53  ;;  %v1163_v43 = vpack.c.bf16 %v1035_v18, %v1035_v18  ;;  %v642_v27 = vpop.f32.mrf.mxu2  ;;  %v722_v29 = vpop.f32.mrf.mxu3  ;;  %v1702_v30 = vadd.f32 %v1701_v25, %v1700_v61  ;;  %v1451_v31 = vsel %vm1399_vm2, %v1035_v18, 0.0 }
 0x136   :  { %1355 = vst.msk [vmem:[%s3504_s4 + $0x150] sm:$0xf] %vm1270_vm1, %v1226_v20  ;;  %v1195_v32 = vpack.c.bf16 %v1067_v19, %v1067_v19  ;;  %v1535_v33 = vsel %vm1399_vm2, %v1067_v19, 0.0  ;;  %v485_v35 = vpop.f32.mrf.mxu0  ;;  %v565_v28 = vpop.f32.mrf.mxu1  ;;  %v1452_v36 = vadd.f32 %v1451_v31, %v1450_v7  ;;  %v839_v38 = vmul.f32 %v2710_v39, %v642_v27 }
 0x137   :  { %1387 = vst.msk [vmem:[%s3504_s4 + $0x1d0] sm:$0xf] %vm1270_vm1, %v1258_v23  ;;  %v1536_v37 = vadd.f32 %v1535_v33, %v1534_v12  ;;  %v871_v58 = vmul.f32 %v2710_v39, %v722_v29  ;;  %v776_v40 = vmul.f32 %v2710_v39, %v485_v35  ;;  %v808_v41 = vmul.f32 %v2710_v39, %v565_v28 }
 0x138   :  { %1292 = vst.msk [vmem:[%s3504_s4 + $0x54] sm:$0xf] %vm1270_vm1, %v1163_v43  ;;  %v971_v42 = vadd.f32 %v2741_v48, %v839_v38 }
 0x139   :  { %1324 = vst.msk [vmem:[%s3504_s4 + $0xd4] sm:$0xf] %vm1270_vm1, %v1195_v32  ;;  %v1003_v44 = vadd.f32 %v2741_v48, %v871_v58  ;;  %v908_v34 = vadd.f32 %v2741_v48, %v776_v40  ;;  %v940_v45 = vadd.f32 %v2741_v48, %v808_v41 }
 0x13a   :  { %v1099_v46 = vmax.f32 %v971_v42, 0.0 }
 0x13b   :  { %v1131_v47 = vmax.f32 %v1003_v44, 0.0  ;;  %v1036_v50 = vmax.f32 %v908_v34, 0.0  ;;  %v1068_v52 = vmax.f32 %v940_v45, 0.0 }
 0x13c   :  { %v1227_v53 = vpack.c.bf16 %v1099_v46, %v1099_v46  ;;  %v1619_v54 = vsel %vm1399_vm2, %v1099_v46, 0.0 }
 0x13d   :  { %v1259_v55 = vpack.c.bf16 %v1131_v47, %v1131_v47  ;;  %v1703_v56 = vsel %vm1399_vm2, %v1131_v47, 0.0  ;;  %v645_v57 = vpop.f32.mrf.mxu2  ;;  %v725_v60 = vpop.f32.mrf.mxu3  ;;  %v1620_v61 = vadd.f32 %v1619_v54, %v1618_v22  ;;  %v1164_v63 = vpack.c.bf16 %v1036_v50, %v1036_v50 }
 0x13e   :  { %v1704_v62 = vadd.f32 %v1703_v56, %v1702_v30  ;;  %v1453_v0 = vsel %vm1399_vm2, %v1036_v50, 0.0  ;;  %v487_v1 = vpop.f32.mrf.mxu0  ;;  %v567_v2 = vpop.f32.mrf.mxu1  ;;  %1356 = vst.msk [vmem:[%s3504_s4 + $0x154] sm:$0xf] %vm1270_vm1, %v1227_v53  ;;  %v1196_v4 = vpack.c.bf16 %v1068_v52, %v1068_v52  ;;  %v1537_v5 = vsel %vm1399_vm2, %v1068_v52, 0.0 }
 0x13f   :  { %v1454_v3 = vadd.f32 %v1453_v0, %v1452_v36  ;;  %v840_v6 = vmul.f32 %v2710_v39, %v645_v57  ;;  %1388 = vst.msk [vmem:[%s3504_s4 + $0x1d4] sm:$0xf] %vm1270_vm1, %v1259_v55  ;;  %v1538_v7 = vadd.f32 %v1537_v5, %v1536_v37  ;;  %v872_v9 = vmul.f32 %v2710_v39, %v725_v60 }
 0x140   :  { %v777_v10 = vmul.f32 %v2710_v39, %v487_v1  ;;  %v809_v11 = vmul.f32 %v2710_v39, %v567_v2  ;;  %1293 = vst.msk [vmem:[%s3504_s4 + $0x58] sm:$0xf] %vm1270_vm1, %v1164_v63 }
 0x141   :  { %v972_v12 = vadd.f32 %v2741_v48, %v840_v6  ;;  %1325 = vst.msk [vmem:[%s3504_s4 + $0xd8] sm:$0xf] %vm1270_vm1, %v1196_v4  ;;  %v1004_v13 = vadd.f32 %v2741_v48, %v872_v9 }
 0x142   :  { %v909_v15 = vadd.f32 %v2741_v48, %v777_v10  ;;  %v941_v8 = vadd.f32 %v2741_v48, %v809_v11 }
 0x143   :  { %v1100_v16 = vmax.f32 %v972_v12, 0.0  ;;  %v1132_v17 = vmax.f32 %v1004_v13, 0.0 }
 0x144   :  { %v1037_v18 = vmax.f32 %v909_v15, 0.0  ;;  %v1069_v19 = vmax.f32 %v941_v8, 0.0 }
 0x145   :  { %v1228_v20 = vpack.c.bf16 %v1100_v16, %v1100_v16  ;;  %v1621_v21 = vsel %vm1399_vm2, %v1100_v16, 0.0  ;;  %v647_v22 = vpop.f32.mrf.mxu2  ;;  %v727_v23 = vpop.f32.mrf.mxu3  ;;  %v1260_v43 = vpack.c.bf16 %v1132_v17, %v1132_v17  ;;  %v1705_v27 = vsel %vm1399_vm2, %v1132_v17, 0.0 }
 0x146   :  { %v1622_v25 = vadd.f32 %v1621_v21, %v1620_v61  ;;  %v1165_v29 = vpack.c.bf16 %v1037_v18, %v1037_v18  ;;  %v1706_v30 = vadd.f32 %v1705_v27, %v1704_v62  ;;  %v1455_v31 = vsel %vm1399_vm2, %v1037_v18, 0.0 }
 0x147   :  { %1357 = vst.msk [vmem:[%s3504_s4 + $0x158] sm:$0xf] %vm1270_vm1, %v1228_v20  ;;  %v1197_v32 = vpack.c.bf16 %v1069_v19, %v1069_v19  ;;  %v1539_v33 = vsel %vm1399_vm2, %v1069_v19, 0.0  ;;  %v490_v35 = vpop.f32.mrf.mxu0  ;;  %v570_v28 = vpop.f32.mrf.mxu1  ;;  %v1456_v36 = vadd.f32 %v1455_v31, %v1454_v3  ;;  %v841_v38 = vmul.f32 %v2710_v39, %v647_v22 }
 0x148   :  { %1389 = vst.msk [vmem:[%s3504_s4 + $0x1d8] sm:$0xf] %vm1270_vm1, %v1260_v43  ;;  %v3070_v37 = vadd.f32 %v1539_v33, %v1538_v7  ;;  %v873_v58 = vmul.f32 %v2710_v39, %v727_v23  ;;  %v778_v40 = vmul.f32 %v2710_v39, %v490_v35  ;;  %v810_v41 = vmul.f32 %v2710_v39, %v570_v28 }
 0x149   :  { %1294 = vst.msk [vmem:[%s3504_s4 + $0x5c] sm:$0xf] %vm1270_vm1, %v1165_v29  ;;  %v1457_v42 = vrot.slane %v1456_v36, 4  ;;  %v973_v44 = vadd.f32 %v2741_v48, %v841_v38 }
 0x14a   :  { %1326 = vst.msk [vmem:[%s3504_s4 + $0xdc] sm:$0xf] %vm1270_vm1, %v1197_v32  ;;  %v1005_v34 = vadd.f32 %v2741_v48, %v873_v58  ;;  %v910_v45 = vadd.f32 %v2741_v48, %v778_v40  ;;  %v942_v46 = vadd.f32 %v2741_v48, %v810_v41 }
 0x14b   :  { %v1458_v47 = vadd.f32 %v1457_v42, %v1456_v36  ;;  %v1101_v50 = vmax.f32 %v973_v44, 0.0 }
 0x14c   :  { %v1133_v52 = vmax.f32 %v1005_v34, 0.0  ;;  %v3088_v53 = vmax.f32 %v910_v45, 0.0  ;;  %v3090_v54 = vmax.f32 %v942_v46, 0.0 }
 0x14d   :  { %v1459_v55 = vrot.slane %v1458_v47, 2  ;;  %v1229_v56 = vpack.c.bf16 %v1101_v50, %v1101_v50  ;;  %v1623_v57 = vsel %vm1399_vm2, %v1101_v50, 0.0  ;;  %v1499_v50 = vrot.slane %v2499_v59, 4 }
 0x14e   :  { %v650_v60 = vpop.f32.mrf.mxu2  ;;  %v730_v61 = vpop.f32.mrf.mxu3  ;;  %v1624_v62 = vadd.f32 %v1623_v57, %v1622_v25  ;;  %v1261_v63 = vpack.c.bf16 %v1133_v52, %v1133_v52  ;;  %v1707_v0 = vsel %vm1399_vm2, %v1133_v52, 0.0  ;;  %v1166_v1 = vpack.c.bf16 %v3088_v53, %v3088_v53 }
 0x14f   :  { %v492_v2 = vpop.f32.mrf.mxu0  ;;  %v572_v3 = vpop.f32.mrf.mxu1  ;;  %v1460_v4 = vadd.f32 %v1459_v55, %v1458_v47  ;;  %1358 = vst.msk [vmem:[%s3504_s4 + $0x15c] sm:$0xf] %vm1270_vm1, %v1229_v56  ;;  %v3100_v5 = vadd.f32 %v1707_v0, %v1706_v30  ;;  %v1198_v7 = vpack.c.bf16 %v3090_v54, %v3090_v54  ;;  %v842_v9 = vmul.f32 %v2710_v39, %v650_v60 }
 0x150   :  { %v1625_v6 = vrot.slane %v1624_v62, 4  ;;  %1390 = vst.msk [vmem:[%s3504_s4 + $0x1dc] sm:$0xf] %vm1270_vm1, %v1261_v63  ;;  %v874_v11 = vmul.f32 %v2710_v39, %v730_v61  ;;  %v779_v15 = vmul.f32 %v2710_v39, %v492_v2  ;;  %v811_v8 = vmul.f32 %v2710_v39, %v572_v3 }
 0x151   :  { %v1461_v10 = vrot.slane %v1460_v4, 1  ;;  %1295 = vst.msk [vmem:[%s3504_s4 + $0x60] sm:$0xf] %vm1270_vm1, %v1166_v1  ;;  %v974_v13 = vadd.f32 %v2741_v48, %v842_v9  ;;  %v1520_v9 = vrot.slane %v2839_v24, 4 }
 0x152   :  { %v1626_v12 = vadd.f32 %v1625_v6, %v1624_v62  ;;  %1327 = vst.msk [vmem:[%s3504_s4 + $0xe0] sm:$0xf] %vm1270_vm1, %v1198_v7  ;;  %v1006_v17 = vadd.f32 %v2741_v48, %v874_v11  ;;  %v911_v20 = vadd.f32 %v2741_v48, %v779_v15  ;;  %v943_v21 = vadd.f32 %v2741_v48, %v811_v8 }
 0x153   :  { %v1462_v16 = vadd.f32 %v1461_v10, %v1460_v4  ;;  %v3122_v19 = vmax.f32 %v974_v13, 0.0 }
 0x154   :  { %v1627_v18 = vrot.slane %v1626_v12, 2  ;;  %v3126_v23 = vmax.f32 %v1006_v17, 0.0  ;;  %v3130_v30 = vmax.f32 %v911_v20, 0.0  ;;  %v3144_v36 = vmax.f32 %v943_v21, 0.0 }
 0x155   :  { %v1738_v22 = vmul.f32 0.015625, %v1462_v16  ;;  %v1230_v29 = vpack.c.bf16 %v3122_v19, %v3122_v19  ;;  %v1667_v17 = vrot.slane %v2527_v14, 4  ;;  %v1521_v20 = vadd.f32 %v1520_v9, %v2839_v24 }
 0x156   :  { %v652_v25 = vpop.f32.mrf.mxu2  ;;  %v732_v43 = vpop.f32.mrf.mxu3  ;;  %v1628_v27 = vadd.f32 %v1627_v18, %v1626_v12  ;;  %v1262_v33 = vpack.c.bf16 %v3126_v23, %v3126_v23  ;;  %v1167_v28 = vpack.c.bf16 %v3130_v30, %v3130_v30  ;;  %v1199_v41 = vpack.c.bf16 %v3144_v36, %v3144_v36 }
 0x157   :  { %v495_v31 = vpop.f32.mrf.mxu0  ;;  %v3134_v32 = vsel %vm1770_vm4, %v1738_v22, %v2889_v26  ;;  %1359 = vst.msk [vmem:[%s3504_s4 + $0x160] sm:$0xf] %vm1270_vm1, %v1230_v29  ;;  %v575_v38 = vpop.f32.mrf.mxu1  ;;  %v843_v26 = vmul.f32 %v2710_v39, %v652_v25  ;;  %v875_v58 = vmul.f32 %v2710_v39, %v732_v43 }
 0x158   :  { %v1629_v35 = vrot.slane %v1628_v27, 1  ;;  %1391 = vst.msk [vmem:[%s3504_s4 + $0x1e0] sm:$0xf] %vm1270_vm1, %v1262_v33  ;;  %v780_v42 = vmul.f32 %v2710_v39, %v495_v31  ;;  %v812_v47 = vmul.f32 %v2710_v39, %v575_v38  ;;  %v1541_v33 = vrot.slane %v3070_v37, 4 }
 0x159   :  { %1296 = vst.msk [vmem:[%s3504_s4 + $0x64] sm:$0xf] %vm1270_vm1, %v1167_v28  ;;  %v975_v44 = vadd.f32 %v2741_v48, %v843_v26  ;;  %v1007_v34 = vadd.f32 %v2741_v48, %v875_v58  ;;  %v3236_v38 = vadd.f32 %v1667_v17, %v2527_v14  ;;  %v3247_v58 = vld [vmem:[%s3502_s2] ss:$0 sm:$0xff]  ;;  %v1547_v17 = vsel %vm1399_vm2, %v3090_v54, 0.0 }
 0x15a   :  { %v1630_v40 = vadd.f32 %v1629_v35, %v1628_v27  ;;  %1328 = vst.msk [vmem:[%s3504_s4 + $0xe4] sm:$0xf] %vm1270_vm1, %v1199_v41  ;;  %v912_v46 = vadd.f32 %v2741_v48, %v780_v42  ;;  %v944_v60 = vadd.f32 %v2741_v48, %v812_v47  ;;  %v1522_v41 = vrot.slane %v1521_v20, 2 }
 0x15b   :  { %v3168_v52 = vmax.f32 %v975_v44, 0.0  ;;  %v3170_v55 = vmax.f32 %v1007_v34, 0.0  ;;  %v3271_v47 = vadd.f32 %v1541_v33, %v3070_v37 }
 0x15c   :  { %v1746_v45 = vmul.f32 0.015625, %v1630_v40  ;;  %v3176_v57 = vmax.f32 %v912_v46, 0.0  ;;  %v3190_v4 = vmax.f32 %v944_v60, 0.0 }
 0x15d   :  { %v1231_v63 = vpack.c.bf16 %v3168_v52, %v3168_v52  ;;  %v1263_v0 = vpack.c.bf16 %v3170_v55, %v3170_v55 }
 0x15e   :  { %v3174_v56 = vsel %vm1770_vm4, %v1746_v45, %v2916_v49  ;;  %v655_v61 = vpop.f32.mrf.mxu2  ;;  %v735_v1 = vpop.f32.mrf.mxu3  ;;  %v1168_v2 = vpack.c.bf16 %v3176_v57, %v3176_v57  ;;  %v1500_v49 = vadd.f32 %v1499_v50, %v2499_v59  ;;  %v1200_v11 = vpack.c.bf16 %v3190_v4, %v3190_v4  ;;  %v3267_v45 = vld [vmem:[%s3503_s3] ss:$0 sm:$0xff] }
 0x15f   :  { %v497_v62 = vpop.f32.mrf.mxu0  ;;  %v577_v3 = vpop.f32.mrf.mxu1  ;;  %1360 = vst.msk [vmem:[%s3504_s4 + $0x164] sm:$0xf] %vm1270_vm1, %v1231_v63  ;;  %v844_v6 = vmul.f32 %v2710_v39, %v655_v61  ;;  %v876_v7 = vmul.f32 %v2710_v39, %v735_v1  ;;  %v1669_v63 = vrot.slane %v3236_v38, 2 }
 0x160   :  { %1392 = vst.msk [vmem:[%s3504_s4 + $0x1e4] sm:$0xf] %vm1270_vm1, %v1263_v0  ;;  %v781_v59 = vmul.f32 %v2710_v39, %v497_v62  ;;  %v813_v10 = vmul.f32 %v2710_v39, %v577_v3  ;;  %v1501_v16 = vrot.slane %v1500_v49, 2  ;;  %v3284_v0 = vadd.f32 %v1522_v41, %v1521_v20 }
 0x161   :  { %1297 = vst.msk [vmem:[%s3504_s4 + $0x68] sm:$0xf] %vm1270_vm1, %v1168_v2  ;;  %v976_v12 = vadd.f32 %v2741_v48, %v844_v6  ;;  %v1008_v13 = vadd.f32 %v2741_v48, %v876_v7 }
 0x162   :  { %v913_v15 = vadd.f32 %v2741_v48, %v781_v59  ;;  %v945_v8 = vadd.f32 %v2741_v48, %v813_v10  ;;  %1329 = vst.msk [vmem:[%s3504_s4 + $0xe8] sm:$0xf] %vm1270_vm1, %v1200_v11  ;;  %v1688_v48 = vrot.slane %v2860_v51, 4  ;;  %v3233_v28 = vadd.f32 %v1501_v16, %v1500_v49 }
 0x163   :  { %v3216_v39 = vmax.f32 %v976_v12, 0.0  ;;  %v3218_v18 = vmax.f32 %v1008_v13, 0.0  ;;  %v1543_v11 = vrot.slane %v3271_v47, 2  ;;  %v1463_v16 = vsel %vm1399_vm2, %v3088_v53, 0.0 }
 0x164   :  { %v3221_v21 = vmax.f32 %v913_v15, 0.0  ;;  %v3228_v29 = vmax.f32 %v945_v8, 0.0  ;;  %v3258_v34 = vadd.f32 %v1688_v48, %v2860_v51  ;;  %v1503_v61 = vrot.slane %v3233_v28, 1 }
 0x165   :  { %v1232_v43 = vpack.c.bf16 %v3216_v39, %v3216_v39  ;;  %v1264_v27 = vpack.c.bf16 %v3218_v18, %v3218_v18  ;;  %v1709_v8 = vrot.slane %v3100_v5, 4  ;;  %v1631_v48 = vsel %vm1399_vm2, %v3122_v19, 0.0 }
 0x166   :  { %v657_v22 = vpop.f32.mrf.mxu2  ;;  %v737_v31 = vpop.f32.mrf.mxu3  ;;  %v1169_v24 = vpack.c.bf16 %v3221_v21, %v3221_v21  ;;  %v1201_v26 = vpack.c.bf16 %v3228_v29, %v3228_v29  ;;  %v1690_v10 = vrot.slane %v3258_v34, 2 }
 0x167   :  { %v500_v25 = vpop.f32.mrf.mxu0  ;;  %v580_v35 = vpop.f32.mrf.mxu1  ;;  %1361 = vst.msk [vmem:[%s3504_s4 + $0x168] sm:$0xf] %vm1270_vm1, %v1232_v43  ;;  %v845_v40 = vmul.f32 %v3247_v58, %v657_v22  ;;  %v877_v14 = vmul.f32 %v3247_v58, %v737_v31  ;;  %v1464_v22 = vsel %vm1399_vm2, %v3130_v30, 0.0  ;;  %v1715_v43 = vsel %vm1399_vm2, %v3126_v23, 0.0 }
 0x168   :  { %1393 = vst.msk [vmem:[%s3504_s4 + $0x1e8] sm:$0xf] %vm1270_vm1, %v1264_v27  ;;  %v782_v42 = vmul.f32 %v3247_v58, %v500_v25  ;;  %v814_v44 = vmul.f32 %v3247_v58, %v580_v35  ;;  %v1548_v25 = vsel %vm1399_vm2, %v3144_v36, 0.0  ;;  %v1632_v27 = vsel %vm1399_vm2, %v3168_v52, 0.0 }
 0x169   :  { %1298 = vst.msk [vmem:[%s3504_s4 + $0x6c] sm:$0xf] %vm1270_vm1, %v1169_v24  ;;  %v977_v46 = vadd.f32 %v3267_v45, %v845_v40  ;;  %v1009_v51 = vadd.f32 %v3267_v45, %v877_v14  ;;  %v1716_v31 = vsel %vm1399_vm2, %v3170_v55, 0.0  ;;  %v1465_v33 = vadd.f32 %v1464_v22, %v1463_v16 }
 0x16a   :  { %1330 = vst.msk [vmem:[%s3504_s4 + $0xec] sm:$0xf] %vm1270_vm1, %v1201_v26  ;;  %v914_v50 = vadd.f32 %v3267_v45, %v782_v42  ;;  %v946_v60 = vadd.f32 %v3267_v45, %v814_v44  ;;  %v1549_v24 = vadd.f32 %v1548_v25, %v1547_v17  ;;  %v1466_v52 = vsel %vm1399_vm2, %v3176_v57, 0.0 }
 0x16b   :  { %v3281_v62 = vmax.f32 %v977_v46, 0.0  ;;  %v3286_v37 = vmax.f32 %v1009_v51, 0.0  ;;  %v1550_v55 = vsel %vm1399_vm2, %v3190_v4, 0.0  ;;  %v1633_v44 = vadd.f32 %v1632_v27, %v1631_v48 }
 0x16c   :  { %v3288_v1 = vmax.f32 %v914_v50, 0.0  ;;  %v3292_v6 = vmax.f32 %v946_v60, 0.0  ;;  %v1717_v46 = vadd.f32 %v1716_v31, %v1715_v43  ;;  %v1718_v57 = vsel %vm1399_vm2, %v3218_v18, 0.0 }
 0x16d   :  { %v1233_v49 = vpack.c.bf16 %v3281_v62, %v3281_v62  ;;  %v1265_v12 = vpack.c.bf16 %v3286_v37, %v3286_v37  ;;  %v1636_v22 = vsel %vm1399_vm2, %v3281_v62, 0.0  ;;  %v1720_v43 = vsel %vm1399_vm2, %v3286_v37, 0.0 }
 0x16e   :  { %v660_v2 = vpop.f32.mrf.mxu2  ;;  %v740_v9 = vpop.f32.mrf.mxu3  ;;  %v1170_v13 = vpack.c.bf16 %v3288_v1, %v3288_v1  ;;  %v1202_v20 = vpack.c.bf16 %v3292_v6, %v3292_v6  ;;  %v1719_v17 = vadd.f32 %v1718_v57, %v1717_v46 }
 0x16f   :  { %v502_v3 = vpop.f32.mrf.mxu0  ;;  %v846_v7 = vmul.f32 %v3247_v58, %v660_v2  ;;  %v582_v15 = vpop.f32.mrf.mxu1  ;;  %1362 = vst.msk [vmem:[%s3504_s4 + $0x16c] sm:$0xf] %vm1270_vm1, %v1233_v49  ;;  %v878_v54 = vmul.f32 %v3247_v58, %v740_v9  ;;  %v1634_v2 = vsel %vm1399_vm2, %v3216_v39, 0.0  ;;  %v1551_v9 = vadd.f32 %v1550_v55, %v1549_v24 }
 0x170   :  { %v783_v59 = vmul.f32 %v3247_v58, %v502_v3  ;;  %1394 = vst.msk [vmem:[%s3504_s4 + $0x1ec] sm:$0xf] %vm1270_vm1, %v1265_v12  ;;  %v815_v36 = vmul.f32 %v3247_v58, %v582_v15  ;;  %v1635_v16 = vadd.f32 %v1634_v2, %v1633_v44 }
 0x171   :  { %v978_v53 = vadd.f32 %v3267_v45, %v846_v7  ;;  %1299 = vst.msk [vmem:[%s3504_s4 + $0x70] sm:$0xf] %vm1270_vm1, %v1170_v13  ;;  %v1010_v23 = vadd.f32 %v3267_v45, %v878_v54  ;;  %v1467_v7 = vadd.f32 %v1466_v52, %v1465_v33 }
 0x172   :  { %v915_v30 = vadd.f32 %v3267_v45, %v783_v59  ;;  %1331 = vst.msk [vmem:[%s3504_s4 + $0xf0] sm:$0xf] %vm1270_vm1, %v1202_v20  ;;  %v947_v26 = vadd.f32 %v3267_v45, %v815_v36  ;;  %v1468_v59 = vsel %vm1399_vm2, %v3221_v21, 0.0  ;;  %v1552_v20 = vsel %vm1399_vm2, %v3228_v29, 0.0 }
 0x173   :  { %v1106_v19 = vmax.f32 %v978_v53, 0.0  ;;  %v3349_v41 = vmax.f32 %v1010_v23, 0.0  ;;  %v1469_v48 = vadd.f32 %v1468_v59, %v1467_v7  ;;  %v1470_v29 = vsel %vm1399_vm2, %v3288_v1, 0.0 }
 0x174   :  { %v3342_v35 = vmax.f32 %v915_v30, 0.0  ;;  %v1075_v50 = vmax.f32 %v947_v26, 0.0  ;;  %v1554_v36 = vsel %vm1399_vm2, %v3292_v6, 0.0  ;;  %v1553_v33 = vadd.f32 %v1552_v20, %v1551_v9 }
 0x175   :  { %v1234_v40 = vpack.c.bf16 %v1106_v19, %v1106_v19  ;;  %v1266_v4 = vpack.c.bf16 %v3349_v41, %v3349_v41  ;;  %v1637_v24 = vadd.f32 %v1636_v22, %v1635_v16  ;;  %v1638_v37 = vsel %vm1399_vm2, %v1106_v19, 0.0 }
 0x176   :  { %v662_v14 = vpop.f32.mrf.mxu2  ;;  %v1171_v51 = vpack.c.bf16 %v3342_v35, %v3342_v35  ;;  %v742_v60 = vpop.f32.mrf.mxu3  ;;  %v1203_v39 = vpack.c.bf16 %v1075_v50, %v1075_v50  ;;  %v1471_v44 = vadd.f32 %v1470_v29, %v1469_v48  ;;  %v1555_v46 = vadd.f32 %v1554_v36, %v1553_v33 }
 0x177   :  { %v505_v42 = vpop.f32.mrf.mxu0  ;;  %1363 = vst.msk [vmem:[%s3504_s4 + $0x170] sm:$0xf] %vm1270_vm1, %v1234_v40  ;;  %v847_v3 = vmul.f32 %v3247_v58, %v662_v14  ;;  %v585_v49 = vpop.f32.mrf.mxu1  ;;  %v879_v18 = vmul.f32 %v3247_v58, %v742_v60  ;;  %v1721_v14 = vadd.f32 %v1720_v43, %v1719_v17  ;;  %v1472_v19 = vsel %vm1399_vm2, %v3342_v35, 0.0 }
 0x178   :  { %1300 = vst.msk [vmem:[%s3504_s4 + $0x74] sm:$0xf] %vm1270_vm1, %v1171_v51  ;;  %v784_v13 = vmul.f32 %v3247_v58, %v505_v42  ;;  %v816_v15 = vmul.f32 %v3247_v58, %v585_v49  ;;  %v1556_v2 = vsel %vm1399_vm2, %v1075_v50, 0.0  ;;  %v1722_v49 = vsel %vm1399_vm2, %v3349_v41, 0.0 }
 0x179   :  { %1395 = vst.msk [vmem:[%s3504_s4 + $0x1f0] sm:$0xf] %vm1270_vm1, %v1266_v4  ;;  %v979_v12 = vadd.f32 %v3267_v45, %v847_v3  ;;  %v1011_v21 = vadd.f32 %v3267_v45, %v879_v18  ;;  %v1639_v3 = vadd.f32 %v1638_v37, %v1637_v24  ;;  %v1473_v59 = vadd.f32 %v1472_v19, %v1471_v44 }
 0x17a   :  { %1332 = vst.msk [vmem:[%s3504_s4 + $0xf4] sm:$0xf] %vm1270_vm1, %v1203_v39  ;;  %v916_v53 = vadd.f32 %v3267_v45, %v784_v13  ;;  %v948_v54 = vadd.f32 %v3267_v45, %v816_v15  ;;  %v1710_v33 = vadd.f32 %v1709_v8, %v3100_v5  ;;  %v1723_v24 = vadd.f32 %v1722_v49, %v1721_v14 }
 0x17b   :  { %v1107_v25 = vmax.f32 %v979_v12, 0.0  ;;  %v1139_v30 = vmax.f32 %v1011_v21, 0.0  ;;  %v1557_v12 = vadd.f32 %v1556_v2, %v1555_v46  ;;  %v1544_v5 = vadd.f32 %v1543_v11, %v3271_v47 }
 0x17c   :  { %v1044_v31 = vmax.f32 %v916_v53, 0.0  ;;  %v1076_v23 = vmax.f32 %v948_v54, 0.0 }
 0x17d   :  { %v1235_v27 = vpack.c.bf16 %v1107_v25, %v1107_v25  ;;  %v1267_v26 = vpack.c.bf16 %v1139_v30, %v1139_v30  ;;  %v1640_v15 = vsel %vm1399_vm2, %v1107_v25, 0.0  ;;  %v1724_v16 = vsel %vm1399_vm2, %v1139_v30, 0.0 }
 0x17e   :  { %v665_v62 = vpop.f32.mrf.mxu2  ;;  %v745_v55 = vpop.f32.mrf.mxu3  ;;  %v1172_v1 = vpack.c.bf16 %v1044_v31, %v1044_v31  ;;  %v1204_v6 = vpack.c.bf16 %v1076_v23, %v1076_v23  ;;  %v1474_v7 = vsel %vm1399_vm2, %v1044_v31, 0.0  ;;  %v1558_v9 = vsel %vm1399_vm2, %v1076_v23, 0.0 }
 0x17f   :  { %v848_v52 = vmul.f32 %v3247_v58, %v665_v62  ;;  %v507_v40 = vpop.f32.mrf.mxu0  ;;  %1364 = vst.msk [vmem:[%s3504_s4 + $0x174] sm:$0xf] %vm1270_vm1, %v1235_v27  ;;  %v587_v42 = vpop.f32.mrf.mxu1  ;;  %v880_v60 = vmul.f32 %v3247_v58, %v745_v55  ;;  %v1475_v22 = vadd.f32 %v1474_v7, %v1473_v59  ;;  %v1559_v53 = vadd.f32 %v1558_v9, %v1557_v12 }
 0x180   :  { %1396 = vst.msk [vmem:[%s3504_s4 + $0x1f4] sm:$0xf] %vm1270_vm1, %v1267_v26  ;;  %v785_v57 = vmul.f32 %v3247_v58, %v507_v40  ;;  %v817_v4 = vmul.f32 %v3247_v58, %v587_v42  ;;  %v1641_v26 = vadd.f32 %v1640_v15, %v1639_v3  ;;  %v1725_v8 = vadd.f32 %v1724_v16, %v1723_v24 }
 0x181   :  { %v980_v51 = vadd.f32 %v3267_v45, %v848_v52  ;;  %1301 = vst.msk [vmem:[%s3504_s4 + $0x78] sm:$0xf] %vm1270_vm1, %v1172_v1  ;;  %v1012_v50 = vadd.f32 %v3267_v45, %v880_v60 }
 0x182   :  { %1333 = vst.msk [vmem:[%s3504_s4 + $0xf8] sm:$0xf] %vm1270_vm1, %v1204_v6  ;;  %v917_v39 = vadd.f32 %v3267_v45, %v785_v57  ;;  %v949_v18 = vadd.f32 %v3267_v45, %v817_v4  ;;  %v1524_v4 = vrot.slane %v3284_v0, 1 }
 0x183   :  { %v1108_v35 = vmax.f32 %v980_v51, 0.0  ;;  %v1140_v41 = vmax.f32 %v1012_v50, 0.0  ;;  %v1670_v51 = vadd.f32 %v1669_v63, %v3236_v38  ;;  %v1504_v38 = vadd.f32 %v1503_v61, %v3233_v28 }
 0x184   :  { %v1045_v17 = vmax.f32 %v917_v39, 0.0  ;;  %v1077_v20 = vmax.f32 %v949_v18, 0.0  ;;  %v1691_v63 = vadd.f32 %v1690_v10, %v3258_v34  ;;  %v1545_v50 = vrot.slane %v1544_v5, 1 }
 0x185   :  { %v1236_v13 = vpack.c.bf16 %v1108_v35, %v1108_v35  ;;  %v1268_v54 = vpack.c.bf16 %v1140_v41, %v1140_v41  ;;  %v1642_v29 = vsel %vm1399_vm2, %v1108_v35, 0.0  ;;  %v1726_v55 = vsel %vm1399_vm2, %v1140_v41, 0.0 }
 0x186   :  { %v667_v21 = vpop.f32.mrf.mxu2  ;;  %v747_v43 = vpop.f32.mrf.mxu3  ;;  %v1173_v36 = vpack.c.bf16 %v1045_v17, %v1045_v17  ;;  %v1476_v25 = vsel %vm1399_vm2, %v1045_v17, 0.0  ;;  %v1205_v30 = vpack.c.bf16 %v1077_v20, %v1077_v20  ;;  %v1560_v31 = vsel %vm1399_vm2, %v1077_v20, 0.0 }
 0x187   :  { %1365 = vst.msk [vmem:[%s3504_s4 + $0x178] sm:$0xf] %vm1270_vm1, %v1236_v13  ;;  %v849_v48 = vmul.f32 %v3247_v58, %v667_v21  ;;  %v1477_v27 = vadd.f32 %v1476_v25, %v1475_v22  ;;  %v881_v62 = vmul.f32 %v3247_v58, %v747_v43  ;;  %v1561_v52 = vadd.f32 %v1560_v31, %v1559_v53 }
 0x188   :  { %1397 = vst.msk [vmem:[%s3504_s4 + $0x1f8] sm:$0xf] %vm1270_vm1, %v1268_v54  ;;  %v1643_v14 = vadd.f32 %v1642_v29, %v1641_v26  ;;  %v1727_v60 = vadd.f32 %v1726_v55, %v1725_v8  ;;  %v1671_v9 = vrot.slane %v1670_v51, 1  ;;  %v1525_v41 = vadd.f32 %v1524_v4, %v3284_v0 }
 0x189   :  { %v981_v23 = vadd.f32 %v3267_v45, %v849_v48  ;;  %1302 = vst.msk [vmem:[%s3504_s4 + $0x7c] sm:$0xf] %vm1270_vm1, %v1173_v36  ;;  %v1478_v40 = vrot.slane %v1477_v27, 4  ;;  %v1013_v37 = vadd.f32 %v3267_v45, %v881_v62  ;;  %v1562_v1 = vrot.slane %v1561_v52, 4 }
 0x18a   :  { %1334 = vst.msk [vmem:[%s3504_s4 + $0xfc] sm:$0xf] %vm1270_vm1, %v1205_v30  ;;  %v1711_v45 = vrot.slane %v1710_v33, 2  ;;  %v1740_v16 = vmul.f32 0.015625, %v1504_v38  ;;  %v1692_v34 = vrot.slane %v1691_v63, 1  ;;  %v1546_v10 = vadd.f32 %v1545_v50, %v1544_v5 }
 0x18b   :  { %v1109_v58 = vmax.f32 %v981_v23, 0.0  ;;  %v1479_v6 = vadd.f32 %v1478_v40, %v1477_v27  ;;  %v1141_v46 = vmax.f32 %v1013_v37, 0.0  ;;  %v1563_v19 = vadd.f32 %v1562_v1, %v1561_v52 }
 0x18c   :  { %v1712_v12 = vadd.f32 %v1711_v45, %v1710_v33  ;;  %v1672_v20 = vadd.f32 %v1671_v9, %v1670_v51  ;;  %v1741_v43 = vmul.f32 0.015625, %v1525_v41  ;;  %v1693_v0 = vadd.f32 %v1692_v34, %v1691_v63 }
 0x18d   :  { %v1237_v42 = vpack.c.bf16 %v1109_v58, %v1109_v58  ;;  %v1644_v44 = vsel %vm1399_vm2, %v1109_v58, 0.0  ;;  %v1480_v57 = vrot.slane %v1479_v6, 2  ;;  %v1269_v47 = vpack.c.bf16 %v1141_v46, %v1141_v46 }
 0x18e   :  { %v1645_v2 = vadd.f32 %v1644_v44, %v1643_v14  ;;  %v1728_v11 = vsel %vm1399_vm2, %v1141_v46, 0.0  ;;  %v1564_v3 = vrot.slane %v1563_v19, 2  ;;  %v1713_v53 = vrot.slane %v1712_v12, 1 }
 0x18f   :  { %1366 = vst.msk [vmem:[%s3504_s4 + $0x17c] sm:$0xf] %vm1270_vm1, %v1237_v42  ;;  %v1729_v35 = vadd.f32 %v1728_v11, %v1727_v60  ;;  %v1481_v7 = vadd.f32 %v1480_v57, %v1479_v6  ;;  %v1742_v25 = vmul.f32 0.015625, %v1546_v10  ;;  %v1748_v40 = vmul.f32 0.015625, %v1672_v20 }
 0x190   :  { %v1646_v49 = vrot.slane %v1645_v2, 4  ;;  %1398 = vst.msk [vmem:[%s3504_s4 + $0x1fc] sm:$0xf] %vm1270_vm1, %v1269_v47  ;;  %v1565_v39 = vadd.f32 %v1564_v3, %v1563_v19  ;;  %v1714_v62 = vadd.f32 %v1713_v53, %v1712_v12  ;;  %v1749_v37 = vmul.f32 0.015625, %v1693_v0 }
 0x191   :  { %v1730_v59 = vrot.slane %v1729_v35, 4  ;;  %v1482_v13 = vrot.slane %v1481_v7, 1 }
 0x192   :  { %v1647_v18 = vadd.f32 %v1646_v49, %v1645_v2  ;;  %v1566_v28 = vrot.slane %v1565_v39, 1  ;;  %v1750_v5 = vmul.f32 0.015625, %v1714_v62 }
 0x193   :  { %v1731_v15 = vadd.f32 %v1730_v59, %v1729_v35  ;;  %v1483_v17 = vadd.f32 %v1482_v13, %v1481_v7 }
 0x194   :  { %v1648_v61 = vrot.slane %v1647_v18, 2  ;;  %v1567_v48 = vadd.f32 %v1566_v28, %v1565_v39 }
 0x195   :  { %v1732_v22 = vrot.slane %v1731_v15, 2  ;;  %v1739_v54 = vmul.f32 0.015625, %v1483_v17 }
 0x196   :  { %v1649_v21 = vadd.f32 %v1648_v61, %v1647_v18  ;;  %v1743_v33 = vmul.f32 0.015625, %v1567_v48 }
 0x197   :  { %v1733_v36 = vadd.f32 %v1732_v22, %v1731_v15  ;;  %v1773_v30 = vsel %vm1772_vm5, %v1739_v54, %v3134_v32 }
 0x198   :  { %v1650_v29 = vrot.slane %v1649_v21, 1  ;;  %v1775_v27 = vsel %vm1774_vm6, %v1740_v16, %v1773_v30 }
 0x199   :  { %v1734_v23 = vrot.slane %v1733_v36, 1  ;;  %v1777_v24 = vsel %vm1776_vm7, %v1741_v43, %v1775_v27 }
 0x19a   :  { %v1651_v31 = vadd.f32 %v1650_v29, %v1649_v21  ;;  %v1779_v26 = vsel %vm1778_vm8, %v1742_v25, %v1777_v24 }
 0x19b   :  { %v1735_v55 = vadd.f32 %v1734_v23, %v1733_v36  ;;  %v1781_v58 = vsel %vm1780_vm9, %v1743_v33, %v1779_v26 }
 0x19c   :  { %v1747_v52 = vmul.f32 0.015625, %v1651_v31  ;;  %1791 = vst.msk [vmem:[%s3505_s5] sm:$0xff] %vm1399_vm2, %v1781_v58 }
 0x19d   :  { %v1751_v14 = vmul.f32 0.015625, %v1735_v55 }
 0x19e   :  { %v1784_v32 = vsel %vm1772_vm5, %v1747_v52, %v3174_v56 }
 0x19f   :  { %v1785_v8 = vsel %vm1774_vm6, %v1748_v40, %v1784_v32 }
 0x1a0   :  { %v1786_v1 = vsel %vm1776_vm7, %v1749_v37, %v1785_v8 }
 0x1a1   :  { %v1787_v6 = vsel %vm1778_vm8, %v1750_v5, %v1786_v1 }
 0x1a2   :  { %v1788_v42 = vsel %vm1780_vm9, %v1751_v14, %v1787_v6 }
 0x1a3   :  { %1792 = vst.msk [vmem:[%s3505_s5 + $0x8] sm:$0xff] %vm1399_vm2, %v1788_v42 }

</bundles_post_ra>
